<compile_context>
chip_gen: v6e
topology: v6e:2x2x1
jax: 0.10.0
libtpu: 0.0.40
codegen_flags: <defaults>
</compile_context>

<pallas_src>
import functools

import jax
import jax.numpy as jnp
from jax import lax
from jax.experimental import pallas as pl
from jax.experimental.pallas import tpu as pltpu

CONV_CHN = 64   # fixed in the PyTorch module
K_SIZE = 3
BN_EPS = 1e-5


def _pool_even_select(L):
    """Host-side constant [L, L//2] matrix: se[i, m] = 1 iff i == 2*m."""
    i = lax.broadcasted_iota(jnp.int32, (L, L // 2), 0)
    m = lax.broadcasted_iota(jnp.int32, (L, L // 2), 1)
    return jnp.where(i == 2 * m, 1.0, 0.0).astype(jnp.float32)


def _conv_block(x, w_ref, scale_ref, shift_ref, sel_ref):
    """One conv_block on a single sample.

    x         : [C_in, L]            f32 activations (L on lanes)
    w_ref     : [K, C_out, C_in]     conv weight (transposed so w_ref[k] is MXU-ready)
    scale_ref : [C_out, 1]           folded BN scale = gamma / sqrt(var + eps)
    shift_ref : [C_out, 1]           folded BN shift = (conv_bias - mean) * scale + beta
    sel_ref   : [L, L // 2]          even-lane selection matrix for MaxPool1d(2)
    returns   : [C_out, L // 2]
    """
    c_in, L = x.shape

    # Shifted copies of x via XLU roll (non-negative shifts only) + boundary mask.
    col = lax.broadcasted_iota(jnp.int32, (c_in, L), dimension=1)
    x_prev = jnp.where(col == 0, 0.0, pltpu.roll(x, 1, axis=1))       # x[:, l-1], 0-padded
    x_next = jnp.where(col == L - 1, 0.0, pltpu.roll(x, L - 1, axis=1))  # x[:, l+1], 0-padded

    # Conv1d(k=3, pad=1):  y[:, l] = W0 @ x[:, l-1] + W1 @ x[:, l] + W2 @ x[:, l+1]
    if c_in == 1:
        # Degenerate contraction dim -> broadcast multiply on the VPU.
        y = (w_ref[1] * x) + (w_ref[0] * x_prev) + (w_ref[2] * x_next)
    else:
        y = (jnp.dot(w_ref[1], x, preferred_element_type=jnp.float32)
             + jnp.dot(w_ref[0], x_prev, preferred_element_type=jnp.float32)
             + jnp.dot(w_ref[2], x_next, preferred_element_type=jnp.float32))

    # Folded (bias + BatchNorm, eval mode) then ReLU.
    y = jnp.maximum(y * scale_ref[...] + shift_ref[...], 0.0)

    # MaxPool1d(kernel_size=2, stride=2): pairwise max via roll, then compact the
    # even lanes with a single selection matmul on the (otherwise idle) MXU.
    p = jnp.maximum(y, pltpu.roll(y, L - 1, axis=1))
    return jnp.dot(p, sel_ref[...], preferred_element_type=jnp.float32)


def _encoder_kernel(*refs, num_blocks):
    x_ref = refs[0]
    out_ref = refs[-1]
    prm = refs[1:-1]                      # (w, scale, shift, sel) * num_blocks

    cur = x_ref[0]                        # [C_in0, L0] for this grid step's sample
    for i in range(num_blocks):
        w_ref, scale_ref, shift_ref, sel_ref = prm[4 * i:4 * i + 4]
        cur = _conv_block(cur, w_ref, scale_ref, shift_ref, sel_ref)
    out_ref[0] = cur                      # [C_out, L_final]


def encoder_forward(x, params, eps=BN_EPS):
    """x: [B, in_chn, L] f32; params: list of dicts per conv_block. Returns [B, C*L_final]."""
    B, c_in0, L = x.shape
    num_blocks = len(params)
    assert L % (2 ** num_blocks) == 0, "sequence length must be divisible by 2**cb_num"
    L_out = L >> num_blocks

    kernel_inputs = [x.astype(jnp.float32)]
    in_specs = [pl.BlockSpec((1, c_in0, L), lambda b: (b, 0, 0))]

    L_cur = L
    for prm in params:
        w = jnp.transpose(prm["weight"].astype(jnp.float32), (2, 0, 1))   # [K, C_out, C_in]
        scale = (prm["gamma"] / jnp.sqrt(prm["var"] + eps)).astype(jnp.float32)   # [C_out]
        shift = ((prm["bias"] - prm["mean"]) * scale + prm["beta"]).astype(jnp.float32)
        sel = _pool_even_select(L_cur)                                     # [L_cur, L_cur//2]
        c_out = w.shape[1]
        kernel_inputs += [w, scale[:, None], shift[:, None], sel]
        in_specs += [
            pl.BlockSpec(w.shape, lambda b: (0, 0, 0)),
            pl.BlockSpec((c_out, 1), lambda b: (0, 0)),
            pl.BlockSpec((c_out, 1), lambda b: (0, 0)),
            pl.BlockSpec(sel.shape, lambda b: (0, 0)),
        ]
        L_cur //= 2

    out = pl.pallas_call(
        functools.partial(_encoder_kernel, num_blocks=num_blocks),
        out_shape=jax.ShapeDtypeStruct((B, CONV_CHN, L_out), jnp.float32),
        grid=(B,),
        in_specs=in_specs,
        out_specs=pl.BlockSpec((1, CONV_CHN, L_out), lambda b: (b, 0, 0)),
        compiler_params=pltpu.CompilerParams(dimension_semantics=("parallel",)),
    )(*kernel_inputs)

    # feat = feat.reshape(x.shape[0], -1)  (row-major, same as torch)
    return out.reshape(B, -1)


def encoder_forward_ref(x, params, eps=BN_EPS):
    """Pure-JAX reference mirroring the PyTorch forward (eval-mode BatchNorm)."""
    B = x.shape[0]
    cur = x.astype(jnp.float32)
    for prm in params:
        y = lax.conv_general_dilated(
            cur, prm["weight"].astype(jnp.float32),
            window_strides=(1,), padding=((1, 1),),
            dimension_numbers=("NCH", "OIH", "NCH"))
        y = y + prm["bias"][None, :, None]
        y = (y - prm["mean"][None, :, None]) / jnp.sqrt(prm["var"][None, :, None] + eps)
        y = y * prm["gamma"][None, :, None] + prm["beta"][None, :, None]
        y = jnp.maximum(y, 0.0)
        Bc, C, Lc = y.shape
        y = y.reshape(Bc, C, Lc // 2, 2).max(axis=-1)
        cur = y
    return cur.reshape(B, -1)


if __name__ == "__main__":
    # Small shapes consistent with the module: in_chn=1, Conv_CHN=64, k=3, pad=1.
    B, in_chn, L = 2, 1, 128
    cb_num = 4                                  # constructor arg; kept small for the demo

    key = jax.random.PRNGKey(0)
    params = []
    c_in = in_chn
    for _ in range(cb_num):
        key, kw, kb, kg, kbe, km, kv = jax.random.split(key, 7)
        params.append(dict(
            weight=0.1 * jax.random.normal(kw, (CONV_CHN, c_in, K_SIZE), jnp.float32),
            bias=0.1 * jax.random.normal(kb, (CONV_CHN,), jnp.float32),
            gamma=1.0 + 0.1 * jax.random.normal(kg, (CONV_CHN,), jnp.float32),
            beta=0.1 * jax.random.normal(kbe, (CONV_CHN,), jnp.float32),
            mean=0.1 * jax.random.normal(km, (CONV_CHN,), jnp.float32),
            var=0.5 + jnp.abs(jax.random.normal(kv, (CONV_CHN,), jnp.float32)),
        ))
        c_in = CONV_CHN

    key, kx = jax.random.split(key)
    x = jax.random.normal(kx, (B, in_chn, L), jnp.float32)

    feat = jax.block_until_ready(encoder_forward(x, params))
    ref = jax.block_until_ready(encoder_forward_ref(x, params))

    assert feat.shape == (B, CONV_CHN * (L >> cb_num)), feat.shape
    max_err = float(jnp.max(jnp.abs(feat - ref)))
    assert jnp.allclose(feat, ref, rtol=1e-3, atol=1e-3), max_err

    print("KERNEL_OK")
</pallas_src>

<mosaic_0001>
module attributes {stable_mosaic.version = 11 : i64} {
  func.func @_encoder_kernel(%arg0: i32, %arg1: memref<1x1x128xf32, #tpu.memory_space<vmem>>, %arg2: memref<3x64x1xf32, #tpu.memory_space<vmem>>, %arg3: memref<64x1xf32, #tpu.memory_space<vmem>>, %arg4: memref<64x1xf32, #tpu.memory_space<vmem>>, %arg5: memref<128x64xf32, #tpu.memory_space<vmem>>, %arg6: memref<3x64x64xf32, #tpu.memory_space<vmem>>, %arg7: memref<64x1xf32, #tpu.memory_space<vmem>>, %arg8: memref<64x1xf32, #tpu.memory_space<vmem>>, %arg9: memref<64x32xf32, #tpu.memory_space<vmem>>, %arg10: memref<3x64x64xf32, #tpu.memory_space<vmem>>, %arg11: memref<64x1xf32, #tpu.memory_space<vmem>>, %arg12: memref<64x1xf32, #tpu.memory_space<vmem>>, %arg13: memref<32x16xf32, #tpu.memory_space<vmem>>, %arg14: memref<3x64x64xf32, #tpu.memory_space<vmem>>, %arg15: memref<64x1xf32, #tpu.memory_space<vmem>>, %arg16: memref<64x1xf32, #tpu.memory_space<vmem>>, %arg17: memref<16x8xf32, #tpu.memory_space<vmem>>, %arg18: memref<1x64x8xf32, #tpu.memory_space<vmem>>) attributes {dimension_semantics = [#tpu.dimension_semantics<parallel>], iteration_bounds = array<i64: 2>, scalar_prefetch = 0 : i64, scratch_operands = 0 : i64, tpu.core_type = #tpu.core_type<tc>, window_params = [{transform_indices = @transform_0, window_bounds = array<i64: 1, 1, 128>}, {pipeline_mode = #tpu.pipeline_mode<synchronous>, transform_indices = @transform_1, window_bounds = array<i64: 3, 64, 1>}, {pipeline_mode = #tpu.pipeline_mode<synchronous>, transform_indices = @transform_2, window_bounds = array<i64: 64, 1>}, {pipeline_mode = #tpu.pipeline_mode<synchronous>, transform_indices = @transform_3, window_bounds = array<i64: 64, 1>}, {pipeline_mode = #tpu.pipeline_mode<synchronous>, transform_indices = @transform_4, window_bounds = array<i64: 128, 64>}, {pipeline_mode = #tpu.pipeline_mode<synchronous>, transform_indices = @transform_5, window_bounds = array<i64: 3, 64, 64>}, {pipeline_mode = #tpu.pipeline_mode<synchronous>, transform_indices = @transform_6, window_bounds = array<i64: 64, 1>}, {pipeline_mode = #tpu.pipeline_mode<synchronous>, transform_indices = @transform_7, window_bounds = array<i64: 64, 1>}, {pipeline_mode = #tpu.pipeline_mode<synchronous>, transform_indices = @transform_8, window_bounds = array<i64: 64, 32>}, {pipeline_mode = #tpu.pipeline_mode<synchronous>, transform_indices = @transform_9, window_bounds = array<i64: 3, 64, 64>}, {pipeline_mode = #tpu.pipeline_mode<synchronous>, transform_indices = @transform_10, window_bounds = array<i64: 64, 1>}, {pipeline_mode = #tpu.pipeline_mode<synchronous>, transform_indices = @transform_11, window_bounds = array<i64: 64, 1>}, {pipeline_mode = #tpu.pipeline_mode<synchronous>, transform_indices = @transform_12, window_bounds = array<i64: 32, 16>}, {pipeline_mode = #tpu.pipeline_mode<synchronous>, transform_indices = @transform_13, window_bounds = array<i64: 3, 64, 64>}, {pipeline_mode = #tpu.pipeline_mode<synchronous>, transform_indices = @transform_14, window_bounds = array<i64: 64, 1>}, {pipeline_mode = #tpu.pipeline_mode<synchronous>, transform_indices = @transform_15, window_bounds = array<i64: 64, 1>}, {pipeline_mode = #tpu.pipeline_mode<synchronous>, transform_indices = @transform_16, window_bounds = array<i64: 16, 8>}, {transform_indices = @transform_17, window_bounds = array<i64: 1, 64, 8>}]} {
    %c0 = arith.constant 0 : index
    %c0_0 = arith.constant 0 : index
    %c0_1 = arith.constant 0 : index
    %0 = vector.load %arg1[%c0, %c0_0, %c0_1] : memref<1x1x128xf32, #tpu.memory_space<vmem>>, vector<1x1x128xf32>
    %1 = vector.shape_cast %0 : vector<1x1x128xf32> to vector<1x128xf32>
    %2 = tpu.iota {dimensions = array<i32: 1>} : vector<1x128xi32>
    %c0_i32 = arith.constant 0 : i32
    %3 = vector.broadcast %c0_i32 : i32 to vector<1x128xi32>
    %4 = arith.cmpi eq, %2, %3 : vector<1x128xi32>
    %c1_i32 = arith.constant 1 : i32
    %5 = tpu.dynamic_rotate %1 by %c1_i32 dim 1 : vector<1x128xf32>, i32 -> vector<1x128xf32>
    %cst = arith.constant 0.000000e+00 : f32
    %6 = vector.broadcast %cst : f32 to vector<1x128xf32>
    %7 = arith.select %4, %6, %5 : vector<1x128xi1>, vector<1x128xf32>
    %c127_i32 = arith.constant 127 : i32
    %8 = vector.broadcast %c127_i32 : i32 to vector<1x128xi32>
    %9 = arith.cmpi eq, %2, %8 : vector<1x128xi32>
    %c127_i32_2 = arith.constant 127 : i32
    %10 = tpu.dynamic_rotate %1 by %c127_i32_2 dim 1 : vector<1x128xf32>, i32 -> vector<1x128xf32>
    %cst_3 = arith.constant 0.000000e+00 : f32
    %11 = vector.broadcast %cst_3 : f32 to vector<1x128xf32>
    %12 = arith.select %9, %11, %10 : vector<1x128xi1>, vector<1x128xf32>
    %c1 = arith.constant 1 : index
    %c0_4 = arith.constant 0 : index
    %c0_5 = arith.constant 0 : index
    %13 = vector.load %arg2[%c1, %c0_4, %c0_5] : memref<3x64x1xf32, #tpu.memory_space<vmem>>, vector<1x64x1xf32>
    %14 = vector.shape_cast %13 : vector<1x64x1xf32> to vector<64x1xf32>
    %15 = vector.broadcast %14 : vector<64x1xf32> to vector<64x128xf32>
    %16 = vector.broadcast %1 : vector<1x128xf32> to vector<64x128xf32>
    %17 = arith.mulf %15, %16 : vector<64x128xf32>
    %c0_6 = arith.constant 0 : index
    %c0_7 = arith.constant 0 : index
    %c0_8 = arith.constant 0 : index
    %18 = vector.load %arg2[%c0_6, %c0_7, %c0_8] : memref<3x64x1xf32, #tpu.memory_space<vmem>>, vector<1x64x1xf32>
    %19 = vector.shape_cast %18 : vector<1x64x1xf32> to vector<64x1xf32>
    %20 = vector.broadcast %19 : vector<64x1xf32> to vector<64x128xf32>
    %21 = vector.broadcast %7 : vector<1x128xf32> to vector<64x128xf32>
    %22 = arith.mulf %20, %21 : vector<64x128xf32>
    %23 = arith.addf %17, %22 : vector<64x128xf32>
    %c2 = arith.constant 2 : index
    %c0_9 = arith.constant 0 : index
    %c0_10 = arith.constant 0 : index
    %24 = vector.load %arg2[%c2, %c0_9, %c0_10] : memref<3x64x1xf32, #tpu.memory_space<vmem>>, vector<1x64x1xf32>
    %25 = vector.shape_cast %24 : vector<1x64x1xf32> to vector<64x1xf32>
    %26 = vector.broadcast %25 : vector<64x1xf32> to vector<64x128xf32>
    %27 = vector.broadcast %12 : vector<1x128xf32> to vector<64x128xf32>
    %28 = arith.mulf %26, %27 : vector<64x128xf32>
    %29 = arith.addf %23, %28 : vector<64x128xf32>
    %c0_11 = arith.constant 0 : index
    %c0_12 = arith.constant 0 : index
    %30 = vector.load %arg3[%c0_11, %c0_12] : memref<64x1xf32, #tpu.memory_space<vmem>>, vector<64x1xf32>
    %31 = vector.broadcast %30 : vector<64x1xf32> to vector<64x128xf32>
    %32 = arith.mulf %29, %31 : vector<64x128xf32>
    %c0_13 = arith.constant 0 : index
    %c0_14 = arith.constant 0 : index
    %33 = vector.load %arg4[%c0_13, %c0_14] : memref<64x1xf32, #tpu.memory_space<vmem>>, vector<64x1xf32>
    %34 = vector.broadcast %33 : vector<64x1xf32> to vector<64x128xf32>
    %35 = arith.addf %32, %34 : vector<64x128xf32>
    %cst_15 = arith.constant 0.000000e+00 : f32
    %36 = vector.broadcast %cst_15 : f32 to vector<64x128xf32>
    %37 = arith.maximumf %35, %36 : vector<64x128xf32>
    %c127_i32_16 = arith.constant 127 : i32
    %38 = tpu.dynamic_rotate %37 by %c127_i32_16 dim 1 : vector<64x128xf32>, i32 -> vector<64x128xf32>
    %39 = arith.maximumf %37, %38 : vector<64x128xf32>
    %c0_17 = arith.constant 0 : index
    %c0_18 = arith.constant 0 : index
    %40 = vector.load %arg5[%c0_17, %c0_18] : memref<128x64xf32, #tpu.memory_space<vmem>>, vector<128x64xf32>
    %cst_19 = arith.constant dense<0.000000e+00> : vector<64x64xf32>
    %41 = tpu.matmul %39, %40, %cst_19 {dimension_numbers = #tpu.dot_dimension_numbers<[1], [0], [0], [1], [0, 0, 1, 1], [], []>} : vector<64x128xf32>, vector<128x64xf32>, vector<64x64xf32> -> vector<64x64xf32>
    %42 = tpu.iota {dimensions = array<i32: 1>} : vector<64x64xi32>
    %c0_i32_20 = arith.constant 0 : i32
    %43 = vector.broadcast %c0_i32_20 : i32 to vector<64x64xi32>
    %44 = arith.cmpi eq, %42, %43 : vector<64x64xi32>
    %c1_i32_21 = arith.constant 1 : i32
    %45 = tpu.dynamic_rotate %41 by %c1_i32_21 dim 1 : vector<64x64xf32>, i32 -> vector<64x64xf32>
    %cst_22 = arith.constant 0.000000e+00 : f32
    %46 = vector.broadcast %cst_22 : f32 to vector<64x64xf32>
    %47 = arith.select %44, %46, %45 : vector<64x64xi1>, vector<64x64xf32>
    %c63_i32 = arith.constant 63 : i32
    %48 = vector.broadcast %c63_i32 : i32 to vector<64x64xi32>
    %49 = arith.cmpi eq, %42, %48 : vector<64x64xi32>
    %c63_i32_23 = arith.constant 63 : i32
    %50 = tpu.dynamic_rotate %41 by %c63_i32_23 dim 1 : vector<64x64xf32>, i32 -> vector<64x64xf32>
    %cst_24 = arith.constant 0.000000e+00 : f32
    %51 = vector.broadcast %cst_24 : f32 to vector<64x64xf32>
    %52 = arith.select %49, %51, %50 : vector<64x64xi1>, vector<64x64xf32>
    %c1_25 = arith.constant 1 : index
    %c0_26 = arith.constant 0 : index
    %c0_27 = arith.constant 0 : index
    %53 = vector.load %arg6[%c1_25, %c0_26, %c0_27] : memref<3x64x64xf32, #tpu.memory_space<vmem>>, vector<1x64x64xf32>
    %54 = vector.shape_cast %53 : vector<1x64x64xf32> to vector<64x64xf32>
    %cst_28 = arith.constant dense<0.000000e+00> : vector<64x64xf32>
    %55 = tpu.matmul %54, %41, %cst_28 {dimension_numbers = #tpu.dot_dimension_numbers<[1], [0], [0], [1], [0, 0, 1, 1], [], []>} : vector<64x64xf32>, vector<64x64xf32>, vector<64x64xf32> -> vector<64x64xf32>
    %c0_29 = arith.constant 0 : index
    %c0_30 = arith.constant 0 : index
    %c0_31 = arith.constant 0 : index
    %56 = vector.load %arg6[%c0_29, %c0_30, %c0_31] : memref<3x64x64xf32, #tpu.memory_space<vmem>>, vector<1x64x64xf32>
    %57 = vector.shape_cast %56 : vector<1x64x64xf32> to vector<64x64xf32>
    %cst_32 = arith.constant dense<0.000000e+00> : vector<64x64xf32>
    %58 = tpu.matmul %57, %47, %cst_32 {dimension_numbers = #tpu.dot_dimension_numbers<[1], [0], [0], [1], [0, 0, 1, 1], [], []>} : vector<64x64xf32>, vector<64x64xf32>, vector<64x64xf32> -> vector<64x64xf32>
    %59 = arith.addf %55, %58 : vector<64x64xf32>
    %c2_33 = arith.constant 2 : index
    %c0_34 = arith.constant 0 : index
    %c0_35 = arith.constant 0 : index
    %60 = vector.load %arg6[%c2_33, %c0_34, %c0_35] : memref<3x64x64xf32, #tpu.memory_space<vmem>>, vector<1x64x64xf32>
    %61 = vector.shape_cast %60 : vector<1x64x64xf32> to vector<64x64xf32>
    %cst_36 = arith.constant dense<0.000000e+00> : vector<64x64xf32>
    %62 = tpu.matmul %61, %52, %cst_36 {dimension_numbers = #tpu.dot_dimension_numbers<[1], [0], [0], [1], [0, 0, 1, 1], [], []>} : vector<64x64xf32>, vector<64x64xf32>, vector<64x64xf32> -> vector<64x64xf32>
    %63 = arith.addf %59, %62 : vector<64x64xf32>
    %c0_37 = arith.constant 0 : index
    %c0_38 = arith.constant 0 : index
    %64 = vector.load %arg7[%c0_37, %c0_38] : memref<64x1xf32, #tpu.memory_space<vmem>>, vector<64x1xf32>
    %65 = vector.broadcast %64 : vector<64x1xf32> to vector<64x64xf32>
    %66 = arith.mulf %63, %65 : vector<64x64xf32>
    %c0_39 = arith.constant 0 : index
    %c0_40 = arith.constant 0 : index
    %67 = vector.load %arg8[%c0_39, %c0_40] : memref<64x1xf32, #tpu.memory_space<vmem>>, vector<64x1xf32>
    %68 = vector.broadcast %67 : vector<64x1xf32> to vector<64x64xf32>
    %69 = arith.addf %66, %68 : vector<64x64xf32>
    %cst_41 = arith.constant 0.000000e+00 : f32
    %70 = vector.broadcast %cst_41 : f32 to vector<64x64xf32>
    %71 = arith.maximumf %69, %70 : vector<64x64xf32>
    %c63_i32_42 = arith.constant 63 : i32
    %72 = tpu.dynamic_rotate %71 by %c63_i32_42 dim 1 : vector<64x64xf32>, i32 -> vector<64x64xf32>
    %73 = arith.maximumf %71, %72 : vector<64x64xf32>
    %c0_43 = arith.constant 0 : index
    %c0_44 = arith.constant 0 : index
    %74 = vector.load %arg9[%c0_43, %c0_44] : memref<64x32xf32, #tpu.memory_space<vmem>>, vector<64x32xf32>
    %cst_45 = arith.constant dense<0.000000e+00> : vector<64x32xf32>
    %75 = tpu.matmul %73, %74, %cst_45 {dimension_numbers = #tpu.dot_dimension_numbers<[1], [0], [0], [1], [0, 0, 1, 1], [], []>} : vector<64x64xf32>, vector<64x32xf32>, vector<64x32xf32> -> vector<64x32xf32>
    %76 = tpu.iota {dimensions = array<i32: 1>} : vector<64x32xi32>
    %c0_i32_46 = arith.constant 0 : i32
    %77 = vector.broadcast %c0_i32_46 : i32 to vector<64x32xi32>
    %78 = arith.cmpi eq, %76, %77 : vector<64x32xi32>
    %c1_i32_47 = arith.constant 1 : i32
    %79 = tpu.dynamic_rotate %75 by %c1_i32_47 dim 1 : vector<64x32xf32>, i32 -> vector<64x32xf32>
    %cst_48 = arith.constant 0.000000e+00 : f32
    %80 = vector.broadcast %cst_48 : f32 to vector<64x32xf32>
    %81 = arith.select %78, %80, %79 : vector<64x32xi1>, vector<64x32xf32>
    %c31_i32 = arith.constant 31 : i32
    %82 = vector.broadcast %c31_i32 : i32 to vector<64x32xi32>
    %83 = arith.cmpi eq, %76, %82 : vector<64x32xi32>
    %c31_i32_49 = arith.constant 31 : i32
    %84 = tpu.dynamic_rotate %75 by %c31_i32_49 dim 1 : vector<64x32xf32>, i32 -> vector<64x32xf32>
    %cst_50 = arith.constant 0.000000e+00 : f32
    %85 = vector.broadcast %cst_50 : f32 to vector<64x32xf32>
    %86 = arith.select %83, %85, %84 : vector<64x32xi1>, vector<64x32xf32>
    %c1_51 = arith.constant 1 : index
    %c0_52 = arith.constant 0 : index
    %c0_53 = arith.constant 0 : index
    %87 = vector.load %arg10[%c1_51, %c0_52, %c0_53] : memref<3x64x64xf32, #tpu.memory_space<vmem>>, vector<1x64x64xf32>
    %88 = vector.shape_cast %87 : vector<1x64x64xf32> to vector<64x64xf32>
    %cst_54 = arith.constant dense<0.000000e+00> : vector<64x32xf32>
    %89 = tpu.matmul %88, %75, %cst_54 {dimension_numbers = #tpu.dot_dimension_numbers<[1], [0], [0], [1], [0, 0, 1, 1], [], []>} : vector<64x64xf32>, vector<64x32xf32>, vector<64x32xf32> -> vector<64x32xf32>
    %c0_55 = arith.constant 0 : index
    %c0_56 = arith.constant 0 : index
    %c0_57 = arith.constant 0 : index
    %90 = vector.load %arg10[%c0_55, %c0_56, %c0_57] : memref<3x64x64xf32, #tpu.memory_space<vmem>>, vector<1x64x64xf32>
    %91 = vector.shape_cast %90 : vector<1x64x64xf32> to vector<64x64xf32>
    %cst_58 = arith.constant dense<0.000000e+00> : vector<64x32xf32>
    %92 = tpu.matmul %91, %81, %cst_58 {dimension_numbers = #tpu.dot_dimension_numbers<[1], [0], [0], [1], [0, 0, 1, 1], [], []>} : vector<64x64xf32>, vector<64x32xf32>, vector<64x32xf32> -> vector<64x32xf32>
    %93 = arith.addf %89, %92 : vector<64x32xf32>
    %c2_59 = arith.constant 2 : index
    %c0_60 = arith.constant 0 : index
    %c0_61 = arith.constant 0 : index
    %94 = vector.load %arg10[%c2_59, %c0_60, %c0_61] : memref<3x64x64xf32, #tpu.memory_space<vmem>>, vector<1x64x64xf32>
    %95 = vector.shape_cast %94 : vector<1x64x64xf32> to vector<64x64xf32>
    %cst_62 = arith.constant dense<0.000000e+00> : vector<64x32xf32>
    %96 = tpu.matmul %95, %86, %cst_62 {dimension_numbers = #tpu.dot_dimension_numbers<[1], [0], [0], [1], [0, 0, 1, 1], [], []>} : vector<64x64xf32>, vector<64x32xf32>, vector<64x32xf32> -> vector<64x32xf32>
    %97 = arith.addf %93, %96 : vector<64x32xf32>
    %c0_63 = arith.constant 0 : index
    %c0_64 = arith.constant 0 : index
    %98 = vector.load %arg11[%c0_63, %c0_64] : memref<64x1xf32, #tpu.memory_space<vmem>>, vector<64x1xf32>
    %99 = vector.broadcast %98 : vector<64x1xf32> to vector<64x32xf32>
    %100 = arith.mulf %97, %99 : vector<64x32xf32>
    %c0_65 = arith.constant 0 : index
    %c0_66 = arith.constant 0 : index
    %101 = vector.load %arg12[%c0_65, %c0_66] : memref<64x1xf32, #tpu.memory_space<vmem>>, vector<64x1xf32>
    %102 = vector.broadcast %101 : vector<64x1xf32> to vector<64x32xf32>
    %103 = arith.addf %100, %102 : vector<64x32xf32>
    %cst_67 = arith.constant 0.000000e+00 : f32
    %104 = vector.broadcast %cst_67 : f32 to vector<64x32xf32>
    %105 = arith.maximumf %103, %104 : vector<64x32xf32>
    %c31_i32_68 = arith.constant 31 : i32
    %106 = tpu.dynamic_rotate %105 by %c31_i32_68 dim 1 : vector<64x32xf32>, i32 -> vector<64x32xf32>
    %107 = arith.maximumf %105, %106 : vector<64x32xf32>
    %c0_69 = arith.constant 0 : index
    %c0_70 = arith.constant 0 : index
    %108 = vector.load %arg13[%c0_69, %c0_70] : memref<32x16xf32, #tpu.memory_space<vmem>>, vector<32x16xf32>
    %cst_71 = arith.constant dense<0.000000e+00> : vector<64x16xf32>
    %109 = tpu.matmul %107, %108, %cst_71 {dimension_numbers = #tpu.dot_dimension_numbers<[1], [0], [0], [1], [0, 0, 1, 1], [], []>} : vector<64x32xf32>, vector<32x16xf32>, vector<64x16xf32> -> vector<64x16xf32>
    %110 = tpu.iota {dimensions = array<i32: 1>} : vector<64x16xi32>
    %c0_i32_72 = arith.constant 0 : i32
    %111 = vector.broadcast %c0_i32_72 : i32 to vector<64x16xi32>
    %112 = arith.cmpi eq, %110, %111 : vector<64x16xi32>
    %c1_i32_73 = arith.constant 1 : i32
    %113 = tpu.dynamic_rotate %109 by %c1_i32_73 dim 1 : vector<64x16xf32>, i32 -> vector<64x16xf32>
    %cst_74 = arith.constant 0.000000e+00 : f32
    %114 = vector.broadcast %cst_74 : f32 to vector<64x16xf32>
    %115 = arith.select %112, %114, %113 : vector<64x16xi1>, vector<64x16xf32>
    %c15_i32 = arith.constant 15 : i32
    %116 = vector.broadcast %c15_i32 : i32 to vector<64x16xi32>
    %117 = arith.cmpi eq, %110, %116 : vector<64x16xi32>
    %c15_i32_75 = arith.constant 15 : i32
    %118 = tpu.dynamic_rotate %109 by %c15_i32_75 dim 1 : vector<64x16xf32>, i32 -> vector<64x16xf32>
    %cst_76 = arith.constant 0.000000e+00 : f32
    %119 = vector.broadcast %cst_76 : f32 to vector<64x16xf32>
    %120 = arith.select %117, %119, %118 : vector<64x16xi1>, vector<64x16xf32>
    %c1_77 = arith.constant 1 : index
    %c0_78 = arith.constant 0 : index
    %c0_79 = arith.constant 0 : index
    %121 = vector.load %arg14[%c1_77, %c0_78, %c0_79] : memref<3x64x64xf32, #tpu.memory_space<vmem>>, vector<1x64x64xf32>
    %122 = vector.shape_cast %121 : vector<1x64x64xf32> to vector<64x64xf32>
    %cst_80 = arith.constant dense<0.000000e+00> : vector<64x16xf32>
    %123 = tpu.matmul %122, %109, %cst_80 {dimension_numbers = #tpu.dot_dimension_numbers<[1], [0], [0], [1], [0, 0, 1, 1], [], []>} : vector<64x64xf32>, vector<64x16xf32>, vector<64x16xf32> -> vector<64x16xf32>
    %c0_81 = arith.constant 0 : index
    %c0_82 = arith.constant 0 : index
    %c0_83 = arith.constant 0 : index
    %124 = vector.load %arg14[%c0_81, %c0_82, %c0_83] : memref<3x64x64xf32, #tpu.memory_space<vmem>>, vector<1x64x64xf32>
    %125 = vector.shape_cast %124 : vector<1x64x64xf32> to vector<64x64xf32>
    %cst_84 = arith.constant dense<0.000000e+00> : vector<64x16xf32>
    %126 = tpu.matmul %125, %115, %cst_84 {dimension_numbers = #tpu.dot_dimension_numbers<[1], [0], [0], [1], [0, 0, 1, 1], [], []>} : vector<64x64xf32>, vector<64x16xf32>, vector<64x16xf32> -> vector<64x16xf32>
    %127 = arith.addf %123, %126 : vector<64x16xf32>
    %c2_85 = arith.constant 2 : index
    %c0_86 = arith.constant 0 : index
    %c0_87 = arith.constant 0 : index
    %128 = vector.load %arg14[%c2_85, %c0_86, %c0_87] : memref<3x64x64xf32, #tpu.memory_space<vmem>>, vector<1x64x64xf32>
    %129 = vector.shape_cast %128 : vector<1x64x64xf32> to vector<64x64xf32>
    %cst_88 = arith.constant dense<0.000000e+00> : vector<64x16xf32>
    %130 = tpu.matmul %129, %120, %cst_88 {dimension_numbers = #tpu.dot_dimension_numbers<[1], [0], [0], [1], [0, 0, 1, 1], [], []>} : vector<64x64xf32>, vector<64x16xf32>, vector<64x16xf32> -> vector<64x16xf32>
    %131 = arith.addf %127, %130 : vector<64x16xf32>
    %c0_89 = arith.constant 0 : index
    %c0_90 = arith.constant 0 : index
    %132 = vector.load %arg15[%c0_89, %c0_90] : memref<64x1xf32, #tpu.memory_space<vmem>>, vector<64x1xf32>
    %133 = vector.broadcast %132 : vector<64x1xf32> to vector<64x16xf32>
    %134 = arith.mulf %131, %133 : vector<64x16xf32>
    %c0_91 = arith.constant 0 : index
    %c0_92 = arith.constant 0 : index
    %135 = vector.load %arg16[%c0_91, %c0_92] : memref<64x1xf32, #tpu.memory_space<vmem>>, vector<64x1xf32>
    %136 = vector.broadcast %135 : vector<64x1xf32> to vector<64x16xf32>
    %137 = arith.addf %134, %136 : vector<64x16xf32>
    %cst_93 = arith.constant 0.000000e+00 : f32
    %138 = vector.broadcast %cst_93 : f32 to vector<64x16xf32>
    %139 = arith.maximumf %137, %138 : vector<64x16xf32>
    %c15_i32_94 = arith.constant 15 : i32
    %140 = tpu.dynamic_rotate %139 by %c15_i32_94 dim 1 : vector<64x16xf32>, i32 -> vector<64x16xf32>
    %141 = arith.maximumf %139, %140 : vector<64x16xf32>
    %c0_95 = arith.constant 0 : index
    %c0_96 = arith.constant 0 : index
    %142 = vector.load %arg17[%c0_95, %c0_96] : memref<16x8xf32, #tpu.memory_space<vmem>>, vector<16x8xf32>
    %cst_97 = arith.constant dense<0.000000e+00> : vector<64x8xf32>
    %143 = tpu.matmul %141, %142, %cst_97 {dimension_numbers = #tpu.dot_dimension_numbers<[1], [0], [0], [1], [0, 0, 1, 1], [], []>} : vector<64x16xf32>, vector<16x8xf32>, vector<64x8xf32> -> vector<64x8xf32>
    %c0_98 = arith.constant 0 : index
    %c0_99 = arith.constant 0 : index
    %c0_100 = arith.constant 0 : index
    %144 = vector.load %arg18[%c0_98, %c0_99, %c0_100] : memref<1x64x8xf32, #tpu.memory_space<vmem>>, vector<1x64x8xf32>
    %145 = vector.shape_cast %144 : vector<1x64x8xf32> to vector<64x8xf32>
    %146 = vector.shape_cast %143 : vector<64x8xf32> to vector<1x64x8xf32>
    tpu.vector_store %arg18[%c0_98, %c0_99, %c0_100], %146 {strides = array<i32>} : memref<1x64x8xf32, #tpu.memory_space<vmem>>, vector<1x64x8xf32>,
    return
  }
  func.func @transform_0(%arg0: i32) -> (i32, i32, i32) {
    %c0_i32 = arith.constant 0 : i32
    %c0_i32_0 = arith.constant 0 : i32
    %c0_i32_1 = arith.constant 0 : i32
    return %arg0, %c0_i32, %c0_i32_0 : i32, i32, i32
  }
  func.func @transform_1(%arg0: i32) -> (i32, i32, i32) {
    %c0_i32 = arith.constant 0 : i32
    %c0_i32_0 = arith.constant 0 : i32
    %c0_i32_1 = arith.constant 0 : i32
    %c0_i32_2 = arith.constant 0 : i32
    return %c0_i32, %c0_i32_0, %c0_i32_1 : i32, i32, i32
  }
  func.func @transform_2(%arg0: i32) -> (i32, i32) {
    %c0_i32 = arith.constant 0 : i32
    %c0_i32_0 = arith.constant 0 : i32
    %c0_i32_1 = arith.constant 0 : i32
    return %c0_i32, %c0_i32_0 : i32, i32
  }
  func.func @transform_3(%arg0: i32) -> (i32, i32) {
    %c0_i32 = arith.constant 0 : i32
    %c0_i32_0 = arith.constant 0 : i32
    %c0_i32_1 = arith.constant 0 : i32
    return %c0_i32, %c0_i32_0 : i32, i32
  }
  func.func @transform_4(%arg0: i32) -> (i32, i32) {
    %c0_i32 = arith.constant 0 : i32
    %c0_i32_0 = arith.constant 0 : i32
    %c0_i32_1 = arith.constant 0 : i32
    return %c0_i32, %c0_i32_0 : i32, i32
  }
  func.func @transform_5(%arg0: i32) -> (i32, i32, i32) {
    %c0_i32 = arith.constant 0 : i32
    %c0_i32_0 = arith.constant 0 : i32
    %c0_i32_1 = arith.constant 0 : i32
    %c0_i32_2 = arith.constant 0 : i32
    return %c0_i32, %c0_i32_0, %c0_i32_1 : i32, i32, i32
  }
  func.func @transform_6(%arg0: i32) -> (i32, i32) {
    %c0_i32 = arith.constant 0 : i32
    %c0_i32_0 = arith.constant 0 : i32
    %c0_i32_1 = arith.constant 0 : i32
    return %c0_i32, %c0_i32_0 : i32, i32
  }
  func.func @transform_7(%arg0: i32) -> (i32, i32) {
    %c0_i32 = arith.constant 0 : i32
    %c0_i32_0 = arith.constant 0 : i32
    %c0_i32_1 = arith.constant 0 : i32
    return %c0_i32, %c0_i32_0 : i32, i32
  }
  func.func @transform_8(%arg0: i32) -> (i32, i32) {
    %c0_i32 = arith.constant 0 : i32
    %c0_i32_0 = arith.constant 0 : i32
    %c0_i32_1 = arith.constant 0 : i32
    return %c0_i32, %c0_i32_0 : i32, i32
  }
  func.func @transform_9(%arg0: i32) -> (i32, i32, i32) {
    %c0_i32 = arith.constant 0 : i32
    %c0_i32_0 = arith.constant 0 : i32
    %c0_i32_1 = arith.constant 0 : i32
    %c0_i32_2 = arith.constant 0 : i32
    return %c0_i32, %c0_i32_0, %c0_i32_1 : i32, i32, i32
  }
  func.func @transform_10(%arg0: i32) -> (i32, i32) {
    %c0_i32 = arith.constant 0 : i32
    %c0_i32_0 = arith.constant 0 : i32
    %c0_i32_1 = arith.constant 0 : i32
    return %c0_i32, %c0_i32_0 : i32, i32
  }
  func.func @transform_11(%arg0: i32) -> (i32, i32) {
    %c0_i32 = arith.constant 0 : i32
    %c0_i32_0 = arith.constant 0 : i32
    %c0_i32_1 = arith.constant 0 : i32
    return %c0_i32, %c0_i32_0 : i32, i32
  }
  func.func @transform_12(%arg0: i32) -> (i32, i32) {
    %c0_i32 = arith.constant 0 : i32
    %c0_i32_0 = arith.constant 0 : i32
    %c0_i32_1 = arith.constant 0 : i32
    return %c0_i32, %c0_i32_0 : i32, i32
  }
  func.func @transform_13(%arg0: i32) -> (i32, i32, i32) {
    %c0_i32 = arith.constant 0 : i32
    %c0_i32_0 = arith.constant 0 : i32
    %c0_i32_1 = arith.constant 0 : i32
    %c0_i32_2 = arith.constant 0 : i32
    return %c0_i32, %c0_i32_0, %c0_i32_1 : i32, i32, i32
  }
  func.func @transform_14(%arg0: i32) -> (i32, i32) {
    %c0_i32 = arith.constant 0 : i32
    %c0_i32_0 = arith.constant 0 : i32
    %c0_i32_1 = arith.constant 0 : i32
    return %c0_i32, %c0_i32_0 : i32, i32
  }
  func.func @transform_15(%arg0: i32) -> (i32, i32) {
    %c0_i32 = arith.constant 0 : i32
    %c0_i32_0 = arith.constant 0 : i32
    %c0_i32_1 = arith.constant 0 : i32
    return %c0_i32, %c0_i32_0 : i32, i32
  }
  func.func @transform_16(%arg0: i32) -> (i32, i32) {
    %c0_i32 = arith.constant 0 : i32
    %c0_i32_0 = arith.constant 0 : i32
    %c0_i32_1 = arith.constant 0 : i32
    return %c0_i32, %c0_i32_0 : i32, i32
  }
  func.func @transform_17(%arg0: i32) -> (i32, i32, i32) {
    %c0_i32 = arith.constant 0 : i32
    %c0_i32_0 = arith.constant 0 : i32
    %c0_i32_1 = arith.constant 0 : i32
    return %arg0, %c0_i32, %c0_i32_0 : i32, i32, i32
  }
}

</mosaic_0001>

<bundles_post_ra>
// kernel: tpu_custom_call.1
= control target key start
LH: loop header
LB: loop body
LE: loop exit
PB: predicated region body
PF: predicated region fallthrough
CT: control target
= control target key end

     0   :  { %s4718_s24 = smov 0   ;;  %s6220_s0 = inlined_call_operand.vmem [shape: f32[2,1,128], index: 0, kind: input, shape index: {}]   ;;  %s6221_s1 = inlined_call_operand.vmem [shape: f32[3,64,1], index: 1, kind: input, shape index: {}]   ;;  %s6222_s2 = inlined_call_operand.vmem [shape: f32[64,1], index: 2, kind: input, shape index: {}]   ;;  %s6223_s3 = inlined_call_operand.vmem [shape: f32[64,1], index: 3, kind: input, shape index: {}]   ;;  %s6224_s4 = inlined_call_operand.vmem [shape: f32[128,64], index: 4, kind: input, shape index: {}]   ;;  %s6225_s5 = inlined_call_operand.vmem [shape: f32[3,64,64], index: 5, kind: input, shape index: {}]   ;;  %s6226_s6 = inlined_call_operand.vmem [shape: f32[64,1], index: 6, kind: input, shape index: {}]   ;;  %s6227_s7 = inlined_call_operand.vmem [shape: f32[64,1], index: 7, kind: input, shape index: {}]   ;;  %s6228_s8 = inlined_call_operand.vmem [shape: f32[64,32], index: 8, kind: input, shape index: {}]   ;;  %s6229_s9 = inlined_call_operand.vmem [shape: f32[3,64,64], index: 9, kind: input, shape index: {}]   ;;  %s6230_s10 = inlined_call_operand.vmem [shape: f32[64,1], index: 10, kind: input, shape index: {}]   ;;  %s6231_s11 = inlined_call_operand.vmem [shape: f32[64,1], index: 11, kind: input, shape index: {}]   ;;  %s6232_s12 = inlined_call_operand.vmem [shape: f32[32,16], index: 12, kind: input, shape index: {}]   ;;  %s6233_s13 = inlined_call_operand.vmem [shape: f32[3,64,64], index: 13, kind: input, shape index: {}]   ;;  %s6234_s14 = inlined_call_operand.vmem [shape: f32[64,1], index: 14, kind: input, shape index: {}]   ;;  %s6235_s15 = inlined_call_operand.vmem [shape: f32[64,1], index: 15, kind: input, shape index: {}]   ;;  %s6236_s16 = inlined_call_operand.vmem [shape: f32[16,8], index: 16, kind: input, shape index: {}]   ;;  %s6237_s17 = inlined_call_operand.vmem [shape: f32[2,64,8], index: 17, kind: output, shape index: {}]  }
   0x1   :  { %6239 = sst [smem:[#allocation2_spill]] %s6220_s0 }
   0x2   :  { %6240 = sst [smem:[#allocation3_spill]] %s6221_s1 }
   0x3 LB: > { %s3737_s25 = sadd.s32 4294967295, %s4617_s24   ;;  %p3741_p0 = scmp.ge.s32.totalorder %s4617_s24, 1  ;;  %s4617_s24 = sphi %s4718_s24, %s27_s24  }
   0x4   : > { %p485_p1 = scmp.lt.s32.totalorder %s4617_s24, 3 }
   0x6   : > { %p486_p2 = pnand %p3741_p0, %p485_p1 }
   0x7   : > { %s6241_s28 = sld [smem:[#allocation3_spill]] (!%p486_p2)  ;;  %p535_p3 = scmp.lt.s32.totalorder (!%p486_p2), %s3737_s25, 1 }
   0x8   : > { %489 = sbr.rel (%p486_p2) target bundleno = 3958 (0xf76), region = 88  ;;  %s6242_s22 = sld [smem:[#allocation2_spill]] (!%p486_p2) }
   0x9   : > { %s4620_s29 = smov (!%p486_p2), 1   ;;  %s4621_s18 = smov (!%p486_p2), 127  }
   0xa   : > { %s4622_s1 = smov (!%p486_p2), 64   ;;  %s4623_s20 = smov (!%p486_p2), 65  }
   0xb   : > { %s4625_s0 = smov (!%p486_p2), 97  }
   0xd   : > { %v3745_v0 = vld [vmem:[%s6241_s28 + $0x48] sm:$0xff]  ;;  %v3744_v1 = vld [vmem:[%s6241_s28 + $0x40] sm:$0xff]  ;;  %v4619_v2 = vmov 0   ;;  %s6246_s25 = smov (!%p535_p3, %s3737_s25), 1  ;;  %v619_v8 = vld [vmem:[%s6241_s28 + $0x10] sm:$0xff]  ;;  %vm1019_vm2 = vcmask 1048064  }
   0xe   : > { %4590 = vset.pattern.permute.xlu1 %v4619_v2  ;;  %4589 = vset.pattern.permute.xlu0 %v4619_v2  ;;  %v618_v3 = vld [vmem:[%s6241_s28 + $0x8] sm:$0xff]  ;;  %v617_v4 = vld [vmem:[%s6241_s28] sm:$0xff]  ;;  %s537_s23 = scalar_lea.vmem %s6242_s22, %s6246_s25  ;;  %v3746_v9 = vld [vmem:[%s6241_s28 + $0x50] sm:$0xff]  ;;  %vm1158_vm3 = vcmask 523264   ;;  %vm1908_vm6 = vcmask 1047808   ;;  %vm2663_vm8 = vcmask 261120  }
   0xf   : > { %570 = vperm.xlu1 %4590, %v3745_v0   ;;  %565 = vperm.xlu0 %4589, %v3744_v1   ;;  %v3752_v5 = vld [vmem:[%s6241_s28 + $0x80] sm:$0xff]  ;;  %v3753_v7 = vld [vmem:[%s6241_s28 + $0x88] sm:$0xff]  ;;  %v620_v10 = vld [vmem:[%s6241_s28 + $0x18] sm:$0xff]  ;;  %v544_v0 = vlaneseq  ;;  %vm2793_vm9 = vcmask 1047680   ;;  %vm3546_vm11 = vcmask 130048   ;;  %vm3676_vm12 = vcmask 64512  }
  0x10   : > { %v4747_v6 = vld [vmem:[%s537_s23] sm:$0x1]  ;;  %v3747_v11 = vld [vmem:[%s6241_s28 + $0x58] sm:$0xff]  ;;  %v3754_v13 = vld [vmem:[%s6241_s28 + $0x90] sm:$0xff] }
  0x11   : > { %v754_v12 = vld [vmem:[%s6222_s2] sm:$0xff]  ;;  %v755_v14 = vld [vmem:[%s6222_s2 + $0x8] sm:$0xff]  ;;  %v3755_v15 = vld [vmem:[%s6241_s28 + $0x98] sm:$0xff]  ;;  %v4899_v1 = vand.u32 127, %v544_v0 }
  0x12   : > { %v621_v16 = vld [vmem:[%s6241_s28 + $0x20] sm:$0xff]  ;;  %v3749_v18 = vld [vmem:[%s6241_s28 + $0x68] sm:$0xff]  ;;  %v756_v22 = vld [vmem:[%s6222_s2 + $0x10] sm:$0xff] }
  0x13   : > { %632 = vperm.xlu1 %4590, %v618_v3   ;;  %627 = vperm.xlu0 %4589, %v617_v4   ;;  %v3748_v17 = vld [vmem:[%s6241_s28 + $0x60] sm:$0xff]  ;;  %v811_v20 = vld [vmem:[%s6223_s3 + $0x8] sm:$0xff]  ;;  %v757_v24 = vld [vmem:[%s6222_s2 + $0x18] sm:$0xff]  ;;  %v605_v4 = vshrl.u32 %v544_v0, 7  ;;  %vm546_vm0 = vcmp.eq.s32.totalorder %v4899_v1, 0  ;;  %vm550_vm1 = vcmp.eq.s32.totalorder %v4899_v1, 127 }
  0x14   : > { %v810_v19 = vld [vmem:[%s6223_s3] sm:$0xff]  ;;  %v622_v21 = vld [vmem:[%s6241_s28 + $0x28] sm:$0xff]  ;;  %v623_v26 = vld [vmem:[%s6241_s28 + $0x30] sm:$0xff]  ;;  %vm4003_vm5 = vcmp.ne.s32.totalorder %v4899_v1, 63  ;;  %vm4004_vm7 = vcmp.ne.s32.totalorder %v4899_v1, 31  ;;  %vm4005_vm10 = vcmp.ne.s32.totalorder %v4899_v1, 15 }
  0x15   : > { %v3756_v23 = vld [vmem:[%s6241_s28 + $0xa0] sm:$0xff]  ;;  %v3757_v25 = vld [vmem:[%s6241_s28 + $0xa8] sm:$0xff]  ;;  %v3750_v27 = vld [vmem:[%s6241_s28 + $0x70] sm:$0xff] }
  0x16   : > { %v3751_v28 = vld [vmem:[%s6241_s28 + $0x78] sm:$0xff]  ;;  %v812_v29 = vld [vmem:[%s6223_s3 + $0x10] sm:$0xff]  ;;  %v758_v32 = vld [vmem:[%s6222_s2 + $0x20] sm:$0xff] }
  0x17   : > { %696 = vperm.xlu1 %4590, %v3752_v5   ;;  %547 = vrot.lane.b32.xlu0 %v4747_v6, %s4620_s29  ;;  %v813_v30 = vld [vmem:[%s6223_s3 + $0x18] sm:$0xff]  ;;  %v3758_v33 = vld [vmem:[%s6241_s28 + $0xb0] sm:$0xff]  ;;  %v759_v34 = vld [vmem:[%s6222_s2 + $0x28] sm:$0xff] }
  0x18   : > { %v624_v31 = vld [vmem:[%s6241_s28 + $0x38] sm:$0xff]  ;;  %v815_v36 = vld [vmem:[%s6223_s3 + $0x28] sm:$0xff]  ;;  %v814_v37 = vld [vmem:[%s6223_s3 + $0x20] sm:$0xff] }
  0x19   : > { %v3759_v35 = vld [vmem:[%s6241_s28 + $0xb8] sm:$0xff]  ;;  %v760_v39 = vld [vmem:[%s6222_s2 + $0x30] sm:$0xff]  ;;  %v911_v44 = vld [vmem:[%s6224_s4 + $0x68] sm:$0xff] }
  0x1a   : > { %v761_v38 = vld [vmem:[%s6222_s2 + $0x38] sm:$0xff]  ;;  %v816_v41 = vld [vmem:[%s6223_s3 + $0x30] sm:$0xff]  ;;  %v910_v45 = vld [vmem:[%s6224_s4 + $0x60] sm:$0xff] }
  0x1b   : > { %551 = vrot.lane.b32.xlu1 %v4747_v6, %s4621_s18  ;;  %701 = vperm.xlu0 %4589, %v3753_v7   ;;  %v817_v40 = vld [vmem:[%s6223_s3 + $0x38] sm:$0xff]  ;;  %v912_v43 = vld [vmem:[%s6224_s4 + $0x70] sm:$0xff]  ;;  %v907_v48 = vld [vmem:[%s6224_s4 + $0x48] sm:$0xff] }
  0x1c   : > { %v913_v42 = vld [vmem:[%s6224_s4 + $0x78] sm:$0xff]  ;;  %v908_v47 = vld [vmem:[%s6224_s4 + $0x50] sm:$0xff]  ;;  %v906_v49 = vld [vmem:[%s6224_s4 + $0x40] sm:$0xff] }
  0x1d   : > { %4212 = vmatprep.subr.mxu0 %v913_v42  ;;  %v909_v46 = vld [vmem:[%s6224_s4 + $0x58] sm:$0xff]  ;;  %v904_v51 = vld [vmem:[%s6224_s4 + $0x30] sm:$0xff]  ;;  %v903_v52 = vld [vmem:[%s6224_s4 + $0x28] sm:$0xff] }
  0x1e   : > { %4213 = vmatpush3.msra.mxu0 %v913_v42  ;;  %v905_v50 = vld [vmem:[%s6224_s4 + $0x38] sm:$0xff]  ;;  %v902_v53 = vld [vmem:[%s6224_s4 + $0x20] sm:$0xff]  ;;  %v900_v55 = vld [vmem:[%s6224_s4 + $0x10] sm:$0xff] }
  0x1f   : > { %637 = vperm.xlu1 %4590, %v619_v8   ;;  %575 = vperm.xlu0 %4589, %v3746_v9   ;;  %v901_v54 = vld [vmem:[%s6224_s4 + $0x18] sm:$0xff]  ;;  %v606_v9 = vsub.s32 0, %v605_v4  ;;  %vm5104_vm4 = vmneg %vm546_vm0  ;;  %v3965_v1 = vld [vmem:[%s6233_s13 + $0xa8] sm:$0xff] }
  0x20   : > { %4214 = vmatprep.subr.mxu0 %v912_v43 }
  0x21   : > { %4215 = vmatpush3.msra.mxu0 %v912_v43 }
  0x22   : > { %4216 = vmatprep.subr.mxu0 %v911_v44 }
  0x23   : > { %642 = vperm.xlu1 %4590, %v620_v10   ;;  %580 = vperm.xlu0 %4589, %v3747_v11  }
  0x24   : > { %4217 = vmatpush3.msra.mxu0 %v911_v44 }
  0x25   : > { %4218 = vmatprep.subr.mxu0 %v910_v45 }
  0x26   : > { %4219 = vmatpush3.msra.mxu0 %v910_v45 }
  0x27   : > { %764 = vperm.xlu1 %4590, %v754_v12   ;;  %706 = vperm.xlu0 %4589, %v3754_v13  }
  0x28   : > { %4220 = vmatprep.subr.mxu0 %v909_v46 }
  0x29   : > { %4221 = vmatpush3.msra.mxu0 %v909_v46 }
  0x2a   : > { %4222 = vmatprep.subr.mxu0 %v908_v47 }
  0x2b   : > { %769 = vperm.xlu1 %4590, %v755_v14   ;;  %711 = vperm.xlu0 %4589, %v3755_v15   ;;  %v4908_v14 = vrot.slane %v4747_v6, %v606_v9 }
  0x2c   : > { %4223 = vmatpush3.msra.mxu0 %v908_v47 }
  0x2d   : > { %4224 = vmatprep.subr.mxu0 %v907_v48 }
  0x2e   : > { %4225 = vmatpush3.msra.mxu0 %v907_v48 }
  0x2f   : > { %647 = vperm.xlu1 %4590, %v621_v16   ;;  %585 = vperm.xlu0 %4589, %v3748_v17  }
  0x30   : > { %4226 = vmatprep.subr.mxu0 %v906_v49 }
  0x31   : > { %4227 = vmatpush3.msra.mxu0 %v906_v49 }
  0x32   : > { %4228 = vmatprep.subr.mxu0 %v905_v50 }
  0x33   : > { %590 = vperm.xlu1 %4590, %v3749_v18   ;;  %820 = vperm.xlu0 %4589, %v810_v19  }
  0x34   : > { %4229 = vmatpush3.msra.mxu0 %v905_v50 }
  0x35   : > { %4230 = vmatprep.subr.mxu0 %v904_v51 }
  0x36   : > { %4231 = vmatpush3.msra.mxu0 %v904_v51 }
  0x37   : > { %825 = vperm.xlu1 %4590, %v811_v20   ;;  %652 = vperm.xlu0 %4589, %v622_v21  }
  0x38   : > { %4232 = vmatprep.subr.mxu0 %v903_v52 }
  0x39   : > { %4233 = vmatpush3.msra.mxu0 %v903_v52 }
  0x3a   : > { %4234 = vmatprep.subr.mxu0 %v902_v53 }
  0x3b   : > { %774 = vperm.xlu1 %4590, %v756_v22   ;;  %716 = vperm.xlu0 %4589, %v3756_v23  }
  0x3c   : > { %4235 = vmatpush3.msra.mxu0 %v902_v53 }
  0x3d   : > { %4236 = vmatprep.subr.mxu0 %v901_v54 }
  0x3e   : > { %4237 = vmatpush3.msra.mxu0 %v901_v54 }
  0x3f   : > { %779 = vperm.xlu1 %4590, %v757_v24   ;;  %721 = vperm.xlu0 %4589, %v3757_v25  }
  0x40   : > { %4238 = vmatprep.subr.mxu0 %v900_v55 }
  0x41   : > { %4239 = vmatpush3.msra.mxu0 %v900_v55 }
  0x43   : > { %657 = vperm.xlu1 %4590, %v623_v26   ;;  %595 = vperm.xlu0 %4589, %v3750_v27   ;;  %v899_v26 = vld [vmem:[%s6224_s4 + $0x8] sm:$0xff]  ;;  %v898_v27 = vld [vmem:[%s6224_s4] sm:$0xff] }
  0x44   : > { %4240 = vmatprep.subr.mxu0 %v899_v26 }
  0x45   : > { %4241 = vmatpush3.msra.mxu0 %v899_v26 }
  0x46   : > { %4242 = vmatprep.subr.mxu0 %v898_v27 }
  0x47   : > { %600 = vperm.xlu1 %4590, %v3751_v28   ;;  %830 = vperm.xlu0 %4589, %v812_v29  }
  0x48   : > { %4243 = vmatpush3.msra.mxu0 %v898_v27 }
  0x4b   : > { %835 = vperm.xlu1 %4590, %v813_v30   ;;  %662 = vperm.xlu0 %4589, %v624_v31  }
  0x4f   : > { %784 = vperm.xlu1 %4590, %v758_v32   ;;  %726 = vperm.xlu0 %4589, %v3758_v33  }
  0x53   : > { %789 = vperm.xlu1 %4590, %v759_v34   ;;  %731 = vperm.xlu0 %4589, %v3759_v35  }
  0x57   : > { %845 = vperm.xlu1 %4590, %v815_v36   ;;  %840 = vperm.xlu0 %4589, %v814_v37  }
  0x5b   : > { %799 = vperm.xlu1 %4590, %v761_v38   ;;  %794 = vperm.xlu0 %4589, %v760_v39  }
  0x5f   : > { %855 = vperm.xlu1 %4590, %v817_v40   ;;  %850 = vperm.xlu0 %4589, %v816_v41  }
  0x8a   : > { %v571_v56 = vpop.permute.xlu1 %570  ;;  %v566_v57 = vpop.permute.xlu0 %565 }
  0x8b   : > { %v609_v19 = vmul.f32 %v4908_v14, %v566_v57  ;;  %v610_v24 = vmul.f32 %v4908_v14, %v571_v56 }
  0x8e   : > { %v633_v58 = vpop.permute.xlu1 %632  ;;  %v628_v59 = vpop.permute.xlu0 %627 }
  0x92   : > { %v697_v60 = vpop.permute.xlu1 %696  ;;  %v548_v61 = vpop.permute.xlu0 %547 }
  0x93   : > { %v549_v8 = vsel %vm546_vm0, 0.0, %v548_v61 }
  0x94   : > { %v4905_v13 = vrot.slane %v549_v8, %v606_v9 }
  0x96   : > { %v552_v62 = vpop.permute.xlu1 %551  ;;  %v702_v63 = vpop.permute.xlu0 %701  ;;  %v669_v18 = vmul.f32 %v4905_v13, %v628_v59  ;;  %v670_v21 = vmul.f32 %v4905_v13, %v633_v58 }
  0x97   : > { %v553_v10 = vsel %vm550_vm1, 0.0, %v552_v62 }
  0x98   : > { %v4910_v15 = vrot.slane %v553_v10, %v606_v9  ;;  %v677_v6 = vadd.f32 %v669_v18, %v609_v19  ;;  %v678_v29 = vadd.f32 %v670_v21, %v610_v24 }
  0x9a   : > { %v638_v2 = vpop.permute.xlu1 %637  ;;  %v576_v3 = vpop.permute.xlu0 %575  ;;  %v738_v20 = vmul.f32 %v4910_v15, %v697_v60  ;;  %v739_v25 = vmul.f32 %v4910_v15, %v702_v63 }
  0x9b   : > { %v671_v46 = vmul.f32 %v4905_v13, %v638_v2  ;;  %v611_v47 = vmul.f32 %v4908_v14, %v576_v3 }
  0x9c   : > { %v746_v28 = vadd.f32 %v738_v20, %v677_v6  ;;  %v747_v33 = vadd.f32 %v739_v25, %v678_v29 }
  0x9d   : > { %v679_v53 = vadd.f32 %v671_v46, %v611_v47 }
  0x9e   : > { %v643_v5 = vpop.permute.xlu1 %642  ;;  %v581_v7 = vpop.permute.xlu0 %580 }
  0x9f   : > { %v672_v48 = vmul.f32 %v4905_v13, %v643_v5  ;;  %v612_v49 = vmul.f32 %v4908_v14, %v581_v7 }
  0xa1   : > { %v680_v55 = vadd.f32 %v672_v48, %v612_v49 }
  0xa2   : > { %v765_v11 = vpop.permute.xlu1 %764  ;;  %v707_v12 = vpop.permute.xlu0 %706 }
  0xa3   : > { %v802_v32 = vmul.f32 %v765_v11, %v746_v28  ;;  %v740_v50 = vmul.f32 %v4910_v15, %v707_v12 }
  0xa5   : > { %v748_v56 = vadd.f32 %v740_v50, %v679_v53 }
  0xa6   : > { %v770_v16 = vpop.permute.xlu1 %769  ;;  %v712_v17 = vpop.permute.xlu0 %711 }
  0xa7   : > { %v803_v34 = vmul.f32 %v770_v16, %v747_v33  ;;  %v741_v54 = vmul.f32 %v4910_v15, %v712_v17 }
  0xa9   : > { %v749_v60 = vadd.f32 %v741_v54, %v680_v55 }
  0xaa   : > { %v648_v22 = vpop.permute.xlu1 %647  ;;  %v586_v23 = vpop.permute.xlu0 %585 }
  0xab   : > { %v673_v3 = vmul.f32 %v4905_v13, %v648_v22  ;;  %v613_v4 = vmul.f32 %v4908_v14, %v586_v23 }
  0xad   : > { %v681_v18 = vadd.f32 %v673_v3, %v613_v4 }
  0xae   : > { %v591_v30 = vpop.permute.xlu1 %590  ;;  %v821_v31 = vpop.permute.xlu0 %820 }
  0xaf   : > { %v4924_v35 = vadd.f32 %v821_v31, %v802_v32  ;;  %v614_v11 = vmul.f32 %v4908_v14, %v591_v30 }
  0xb1   : > { %v866_v39 = vmax.f32 %v4924_v35, 0.0 }
  0xb2   : > { %v826_v36 = vpop.permute.xlu1 %825  ;;  %v653_v37 = vpop.permute.xlu0 %652 }
  0xb3   : > { %v4926_v38 = vadd.f32 %v826_v36, %v803_v34  ;;  %v674_v5 = vmul.f32 %v4905_v13, %v653_v37 }
  0xb5   : > { %v867_v40 = vmax.f32 %v4926_v38, 0.0  ;;  %v682_v19 = vadd.f32 %v674_v5, %v614_v11 }
  0xb6   : > { %v775_v41 = vpop.permute.xlu1 %774  ;;  %v717_v42 = vpop.permute.xlu0 %716 }
  0xb7   : > { %v4591_v43 = vpack.i.bf16 %v867_v40, %v866_v39  ;;  %v804_v59 = vmul.f32 %v775_v41, %v748_v56  ;;  %v742_v12 = vmul.f32 %v4910_v15, %v717_v42 }
  0xb9   : > { %4592 = vrot.lane.b32.xlu0 %v4591_v43, %s4621_s18  ;;  %v750_v22 = vadd.f32 %v742_v12, %v681_v18 }
  0xba   : > { %v780_v44 = vpop.permute.xlu1 %779  ;;  %v722_v45 = vpop.permute.xlu0 %721 }
  0xbb   : > { %v805_v61 = vmul.f32 %v780_v44, %v749_v60  ;;  %v743_v16 = vmul.f32 %v4910_v15, %v722_v45 }
  0xbd   : > { %v751_v23 = vadd.f32 %v743_v16, %v682_v19 }
  0xbe   : > { %v658_v51 = vpop.permute.xlu1 %657  ;;  %v596_v52 = vpop.permute.xlu0 %595 }
  0xbf   : > { %v675_v24 = vmul.f32 %v4905_v13, %v658_v51  ;;  %v615_v25 = vmul.f32 %v4908_v14, %v596_v52 }
  0xc1   : > { %v683_v36 = vadd.f32 %v675_v24, %v615_v25 }
  0xc2   : > { %v601_v57 = vpop.permute.xlu1 %600  ;;  %v831_v58 = vpop.permute.xlu0 %830 }
  0xc3   : > { %v4941_v62 = vadd.f32 %v831_v58, %v804_v59  ;;  %v616_v28 = vmul.f32 %v4908_v14, %v601_v57 }
  0xc5   : > { %v868_v7 = vmax.f32 %v4941_v62, 0.0 }
  0xc6   : > { %v836_v63 = vpop.permute.xlu1 %835  ;;  %v663_v0 = vpop.permute.xlu0 %662 }
  0xc7   : > { %v4943_v2 = vadd.f32 %v836_v63, %v805_v61  ;;  %v676_v6 = vmul.f32 %v4905_v13, %v663_v0 }
  0xc9   : > { %v869_v8 = vmax.f32 %v4943_v2, 0.0  ;;  %v684_v37 = vadd.f32 %v676_v6, %v616_v28 }
  0xca   : > { %v785_v9 = vpop.permute.xlu1 %784  ;;  %v727_v10 = vpop.permute.xlu0 %726 }
  0xcb   : > { %v4596_v17 = vpack.i.bf16 %v869_v8, %v868_v7  ;;  %v806_v26 = vmul.f32 %v785_v9, %v750_v22  ;;  %v744_v31 = vmul.f32 %v4910_v15, %v727_v10 }
  0xcd   : > { %4597 = vrot.lane.b32.xlu1 %v4596_v17, %s4621_s18  ;;  %v752_v13 = vadd.f32 %v744_v31, %v683_v36 }
  0xce   : > { %v790_v20 = vpop.permute.xlu1 %789  ;;  %v732_v21 = vpop.permute.xlu0 %731 }
  0xcf   : > { %v807_v27 = vmul.f32 %v790_v20, %v751_v23  ;;  %v745_v32 = vmul.f32 %v4910_v15, %v732_v21 }
  0xd1   : > { %v753_v45 = vadd.f32 %v745_v32, %v684_v37 }
  0xd2   : > { %v846_v29 = vpop.permute.xlu1 %845  ;;  %v841_v30 = vpop.permute.xlu0 %840 }
  0xd3   : > { %v863_v33 = vadd.f32 %v846_v29, %v807_v27  ;;  %v862_v34 = vadd.f32 %v841_v30, %v806_v26 }
  0xd5   : > { %v871_v41 = vmax.f32 %v863_v33, 0.0  ;;  %v870_v42 = vmax.f32 %v862_v34, 0.0 }
  0xd6   : > { %v800_v43 = vpop.permute.xlu1 %799  ;;  %v795_v44 = vpop.permute.xlu0 %794 }
  0xd7   : > { %v4601_v46 = vpack.i.bf16 %v871_v41, %v870_v42  ;;  %v809_v47 = vmul.f32 %v800_v43, %v753_v45  ;;  %v808_v48 = vmul.f32 %v795_v44, %v752_v13 }
  0xd9   : > { %4602 = vrot.lane.b32.xlu0 %v4601_v46, %s4621_s18 }
  0xda   : > { %v856_v14 = vpop.permute.xlu1 %855  ;;  %v851_v49 = vpop.permute.xlu0 %850 }
  0xdb   : > { %v865_v50 = vadd.f32 %v856_v14, %v809_v47  ;;  %v864_v51 = vadd.f32 %v851_v49, %v808_v48 }
  0xdd   : > { %v873_v15 = vmax.f32 %v865_v50, 0.0  ;;  %v872_v52 = vmax.f32 %v864_v51, 0.0 }
  0xdf   : > { %v4606_v53 = vpack.i.bf16 %v873_v15, %v872_v52 }
  0xe1   : > { %4607 = vrot.lane.b32.xlu1 %v4606_v53, %s4621_s18  ;;  %v1563_v53 = vld [vmem:[%s6226_s6] sm:$0xff] }
 0x12b   : > { %v4593_v54 = vpop.permute.xlu0 %4592 }
 0x12c   : > { %v4595_v55 = vunpack.i.h.bf16 %v4593_v54  ;;  %v4594_v56 = vunpack.i.l.bf16 %v4593_v54  ;;  %v1564_v54 = vld [vmem:[%s6226_s6 + $0x8] sm:$0xff] }
 0x12e   : > { %v890_v57 = vmax.f32 %v866_v39, %v4594_v56  ;;  %v891_v58 = vmax.f32 %v867_v40, %v4595_v55  ;;  %v1619_v55 = vld [vmem:[%s6227_s7] sm:$0xff]  ;;  %v1620_v56 = vld [vmem:[%s6227_s7 + $0x8] sm:$0xff] }
 0x130   : > { %4244 = vmatprep.mubr.f32.mxu0 %v890_v57  ;;  %v1565_v57 = vld [vmem:[%s6226_s6 + $0x10] sm:$0xff] }
 0x131   : > { %4245 = vmatmul.mubr.f32.vlgmr.msra.gmra.mxu0 %v891_v58  ;;  %v1566_v58 = vld [vmem:[%s6226_s6 + $0x18] sm:$0xff] }
 0x13f   : > { %v4598_v59 = vpop.permute.xlu1 %4597 }
 0x140   : > { %v4600_v60 = vunpack.i.h.bf16 %v4598_v59  ;;  %v4599_v61 = vunpack.i.l.bf16 %v4598_v59  ;;  %v1621_v59 = vld [vmem:[%s6227_s7 + $0x10] sm:$0xff] }
 0x142   : > { %v892_v62 = vmax.f32 %v868_v7, %v4599_v61  ;;  %v893_v63 = vmax.f32 %v869_v8, %v4600_v60  ;;  %v1622_v60 = vld [vmem:[%s6227_s7 + $0x18] sm:$0xff]  ;;  %v1567_v61 = vld [vmem:[%s6226_s6 + $0x20] sm:$0xff] }
 0x144   : > { %4247 = vmatprep.mubr.f32.mxu0 %v892_v62  ;;  %v1568_v62 = vld [vmem:[%s6226_s6 + $0x28] sm:$0xff] }
 0x145   : > { %4248 = vmatmul.mubr.f32.gmra.mxu0 %v893_v63  ;;  %v1623_v63 = vld [vmem:[%s6227_s7 + $0x20] sm:$0xff] }
 0x14b   : > { %v4603_v0 = vpop.permute.xlu0 %4602 }
 0x14c   : > { %v4605_v2 = vunpack.i.h.bf16 %v4603_v0  ;;  %v4604_v3 = vunpack.i.l.bf16 %v4603_v0  ;;  %v1624_v0 = vld [vmem:[%s6227_s7 + $0x28] sm:$0xff] }
 0x14e   : > { %v894_v4 = vmax.f32 %v870_v42, %v4604_v3  ;;  %v895_v5 = vmax.f32 %v871_v41, %v4605_v2  ;;  %v1150_v42 = vld [vmem:[%s6225_s5] sm:$0xff]  ;;  %v1569_v2 = vld [vmem:[%s6226_s6 + $0x30] sm:$0xff]  ;;  %v1570_v3 = vld [vmem:[%s6226_s6 + $0x38] sm:$0xff] }
 0x14f   : > { %4272 = vmatprep.mubr.msk.f32.mxu1 %vm1158_vm3, %v1150_v42  ;;  %v3765_v42 = vld [vmem:[%s6225_s5 + $0x68] sm:$0xff] }
 0x150   : > { %4250 = vmatprep.mubr.f32.mxu0 %v894_v4  ;;  %v1625_v4 = vld [vmem:[%s6227_s7 + $0x30] sm:$0xff] }
 0x151   : > { %4251 = vmatmul.mubr.f32.gmra.mxu0 %v895_v5  ;;  %v1626_v5 = vld [vmem:[%s6227_s7 + $0x38] sm:$0xff] }
 0x153   : > { %v4608_v35 = vpop.permute.xlu1 %4607 }
 0x154   : > { %v4610_v39 = vunpack.i.h.bf16 %v4608_v35  ;;  %v4609_v38 = vunpack.i.l.bf16 %v4608_v35  ;;  %v2928_v35 = vld [vmem:[%s6233_s13 + $0x20] sm:$0xff] }
 0x156   : > { %v896_v40 = vmax.f32 %v872_v52, %v4609_v38  ;;  %v897_v9 = vmax.f32 %v873_v15, %v4610_v39  ;;  %v3800_v52 = vld [vmem:[%s6225_s5 + $0x80] sm:$0xff] }
 0x158   : > { %4253 = vmatprep.mubr.f32.mxu0 %v896_v40 }
 0x159   : > { %4254 = vmatmul.mubr.f32.gmra.mxu0 %v897_v9 }
 0x15a   : > { %4328 = vmatprep.mubr.msk.f32.mxu0 %vm1158_vm3, %v3800_v52 }
 0x1f1   : > { %v4966_v10 = vpop.f32.mrf.mxu0 }
 0x1f3   : > { %v4968_v7 = vpop.f32.mrf.mxu0 }
 0x205   : > { %v4970_v8 = vpop.f32.mrf.mxu0 }
 0x207   : > { %v4972_v11 = vpop.f32.mrf.mxu0 }
 0x211   : > { %v4974_v12 = vpop.f32.mrf.mxu0 }
 0x213   : > { %v4976_v16 = vpop.f32.mrf.mxu0 }
 0x219   : > { %v4978_v17 = vpop.f32.mrf.mxu0 }
 0x21a   : > { %1041 = vrot.lane.b32.xlu0 %v4978_v17, %s4622_s1 }
 0x21b   : > { %v4982_v18 = vpop.f32.mrf.mxu0 }
 0x21c   : > { %1038 = vrot.lane.b32.xlu1 %v4982_v18, %s4622_s1 }
 0x21e   : > { %1035 = vrot.lane.b32.xlu0 %v4974_v12, %s4622_s1 }
 0x220   : > { %1032 = vrot.lane.b32.xlu1 %v4976_v16, %s4622_s1 }
 0x222   : > { %1029 = vrot.lane.b32.xlu0 %v4970_v8, %s4622_s1 }
 0x224   : > { %1026 = vrot.lane.b32.xlu1 %v4972_v11, %s4622_s1 }
 0x226   : > { %1023 = vrot.lane.b32.xlu0 %v4966_v10, %s4622_s1 }
 0x228   : > { %1020 = vrot.lane.b32.xlu1 %v4968_v7, %s4622_s1 }
 0x28c   : > { %v1042_v19 = vpop.permute.xlu0 %1041 }
 0x28d   : > { %v1043_v20 = vsel %vm1019_vm2, %v1042_v19, %v4978_v17 }
 0x28e   : > { %1058 = vrot.lane.b32.xlu0 %v1043_v20, %s4622_s1  ;;  %v1039_v21 = vpop.permute.xlu1 %1038 }
 0x28f   : > { %v1040_v22 = vsel %vm1019_vm2, %v1039_v21, %v4982_v18 }
 0x290   : > { %v1036_v23 = vpop.permute.xlu0 %1035  ;;  %1056 = vrot.lane.b32.xlu1 %v1040_v22, %s4622_s1 }
 0x291   : > { %v1037_v24 = vsel %vm1019_vm2, %v1036_v23, %v4974_v12  ;;  %v1151_v23 = vld [vmem:[%s6225_s5 + $0x8] sm:$0xff] }
 0x292   : > { %1054 = vrot.lane.b32.xlu0 %v1037_v24, %s4622_s1  ;;  %v1033_v25 = vpop.permute.xlu1 %1032 }
 0x293   : > { %v1034_v6 = vsel %vm1019_vm2, %v1033_v25, %v4976_v16  ;;  %v1152_v25 = vld [vmem:[%s6225_s5 + $0x10] sm:$0xff] }
 0x294   : > { %v1030_v26 = vpop.permute.xlu0 %1029  ;;  %1052 = vrot.lane.b32.xlu1 %v1034_v6, %s4622_s1 }
 0x295   : > { %v1031_v27 = vsel %vm1019_vm2, %v1030_v26, %v4970_v8  ;;  %v1153_v26 = vld [vmem:[%s6225_s5 + $0x18] sm:$0xff] }
 0x296   : > { %1050 = vrot.lane.b32.xlu0 %v1031_v27, %s4622_s1  ;;  %v1027_v28 = vpop.permute.xlu1 %1026 }
 0x297   : > { %v1028_v29 = vsel %vm1019_vm2, %v1027_v28, %v4972_v11  ;;  %v1154_v28 = vld [vmem:[%s6225_s5 + $0x20] sm:$0xff] }
 0x298   : > { %v1024_v30 = vpop.permute.xlu0 %1023  ;;  %1048 = vrot.lane.b32.xlu1 %v1028_v29, %s4622_s1  ;;  %v1155_v29 = vld [vmem:[%s6225_s5 + $0x28] sm:$0xff] }
 0x299   : > { %v1025_v31 = vsel %vm1019_vm2, %v1024_v30, %v4966_v10  ;;  %v1156_v30 = vld [vmem:[%s6225_s5 + $0x30] sm:$0xff] }
 0x29a   : > { %1046 = vrot.lane.b32.xlu0 %v1025_v31, %s4622_s1  ;;  %v1021_v32 = vpop.permute.xlu1 %1020 }
 0x29b   : > { %v1022_v33 = vsel %vm1019_vm2, %v1021_v32, %v4968_v7  ;;  %v3760_v32 = vld [vmem:[%s6225_s5 + $0x40] sm:$0xff] }
 0x29c   : > { %1044 = vrot.lane.b32.xlu1 %v1022_v33, %s4622_s1  ;;  %v3801_v33 = vld [vmem:[%s6225_s5 + $0x88] sm:$0xff] }
 0x300   : > { %v1059_v34 = vpop.permute.xlu0 %1058 }
 0x301   : > { %v1067_v36 = vsel %vm1019_vm2, %v1059_v34, %v4978_v17  ;;  %v3802_v34 = vld [vmem:[%s6225_s5 + $0x90] sm:$0xff] }
 0x302   : > { %1090 = vrot.lane.b32.xlu0 %v1067_v36, %s4623_s20  ;;  %v1057_v37 = vpop.permute.xlu1 %1056 }
 0x303   : > { %v1066_v41 = vsel %vm1019_vm2, %v1057_v37, %v4982_v18  ;;  %v3764_v37 = vld [vmem:[%s6225_s5 + $0x60] sm:$0xff] }
 0x304   : > { %v1055_v43 = vpop.permute.xlu0 %1054  ;;  %1088 = vrot.lane.b32.xlu1 %v1066_v41, %s4623_s20 }
 0x305   : > { %v1065_v44 = vsel %vm1019_vm2, %v1055_v43, %v4974_v12  ;;  %v3805_v43 = vld [vmem:[%s6225_s5 + $0xa8] sm:$0xff] }
 0x306   : > { %1086 = vrot.lane.b32.xlu0 %v1065_v44, %s4623_s20  ;;  %v1053_v45 = vpop.permute.xlu1 %1052 }
 0x307   : > { %v1064_v13 = vsel %vm1019_vm2, %v1053_v45, %v4976_v16  ;;  %v3806_v45 = vld [vmem:[%s6225_s5 + $0xb0] sm:$0xff] }
 0x308   : > { %v1051_v46 = vpop.permute.xlu0 %1050  ;;  %1084 = vrot.lane.b32.xlu1 %v1064_v13, %s4623_s20 }
 0x309   : > { %v1063_v47 = vsel %vm1019_vm2, %v1051_v46, %v4970_v8  ;;  %v3807_v46 = vld [vmem:[%s6225_s5 + $0xb8] sm:$0xff] }
 0x30a   : > { %1082 = vrot.lane.b32.xlu0 %v1063_v47, %s4623_s20  ;;  %v1049_v48 = vpop.permute.xlu1 %1048 }
 0x30b   : > { %v1062_v14 = vsel %vm1019_vm2, %v1049_v48, %v4972_v11 }
 0x30c   : > { %v1047_v49 = vpop.permute.xlu0 %1046  ;;  %1080 = vrot.lane.b32.xlu1 %v1062_v14, %s4623_s20 }
 0x30d   : > { %v1061_v50 = vsel %vm1019_vm2, %v1047_v49, %v4966_v10 }
 0x30e   : > { %1078 = vrot.lane.b32.xlu0 %v1061_v50, %s4623_s20  ;;  %v1045_v51 = vpop.permute.xlu1 %1044 }
 0x30f   : > { %v1060_v15 = vsel %vm1019_vm2, %v1045_v51, %v4968_v7 }
 0x310   : > { %1076 = vrot.lane.b32.xlu1 %v1060_v15, %s4623_s20 }
 0x312   : > { %1123 = vrot.lane.b32.xlu0 %v1067_v36, %s4621_s18  ;;  %v3803_v36 = vld [vmem:[%s6225_s5 + $0x98] sm:$0xff] }
 0x314   : > { %1121 = vrot.lane.b32.xlu1 %v1066_v41, %s4621_s18  ;;  %v3804_v41 = vld [vmem:[%s6225_s5 + $0xa0] sm:$0xff] }
 0x316   : > { %1119 = vrot.lane.b32.xlu0 %v1065_v44, %s4621_s18  ;;  %v3766_v44 = vld [vmem:[%s6225_s5 + $0x70] sm:$0xff] }
 0x318   : > { %1117 = vrot.lane.b32.xlu1 %v1064_v13, %s4621_s18  ;;  %v3767_v13 = vld [vmem:[%s6225_s5 + $0x78] sm:$0xff] }
 0x31a   : > { %1115 = vrot.lane.b32.xlu0 %v1063_v47, %s4621_s18 }
 0x31c   : > { %1113 = vrot.lane.b32.xlu1 %v1062_v14, %s4621_s18 }
 0x31e   : > { %1111 = vrot.lane.b32.xlu0 %v1061_v50, %s4621_s18 }
 0x320   : > { %1109 = vrot.lane.b32.xlu1 %v1060_v15, %s4621_s18 }
 0x322   : > { %1573 = vperm.xlu0 %4589, %v1563_v53  }
 0x324   : > { %1578 = vperm.xlu1 %4590, %v1564_v54  }
 0x326   : > { %1629 = vperm.xlu0 %4589, %v1619_v55  }
 0x328   : > { %1634 = vperm.xlu1 %4590, %v1620_v56  }
 0x32a   : > { %1583 = vperm.xlu0 %4589, %v1565_v57  }
 0x32c   : > { %1588 = vperm.xlu1 %4590, %v1566_v58  }
 0x32e   : > { %1639 = vperm.xlu0 %4589, %v1621_v59  }
 0x330   : > { %1644 = vperm.xlu1 %4590, %v1622_v60  }
 0x332   : > { %1593 = vperm.xlu0 %4589, %v1567_v61  }
 0x334   : > { %1598 = vperm.xlu1 %4590, %v1568_v62  }
 0x336   : > { %1649 = vperm.xlu0 %4589, %v1623_v63  }
 0x338   : > { %1654 = vperm.xlu1 %4590, %v1624_v0  }
 0x33a   : > { %1603 = vperm.xlu0 %4589, %v1569_v2  }
 0x33c   : > { %1608 = vperm.xlu1 %4590, %v1570_v3  }
 0x33e   : > { %1659 = vperm.xlu0 %4589, %v1625_v4  }
 0x340   : > { %1664 = vperm.xlu1 %4590, %v1626_v5  }
 0x374   : > { %v1091_v39 = vpop.permute.xlu0 %1090 }
 0x375   : > { %4256 = vmatprep.subr.msk.mxu1 %vm5104_vm4, %v1091_v39 }
 0x376   : > { %4257 = vmatpush3.msk.msra.mxu1 %vm5104_vm4, %v1091_v39  ;;  %v1089_v38 = vpop.permute.xlu1 %1088 }
 0x377   : > { %4258 = vmatprep.subr.msk.mxu1 %vm5104_vm4, %v1089_v38 }
 0x378   : > { %v1087_v40 = vpop.permute.xlu0 %1086  ;;  %4259 = vmatpush3.msk.msra.mxu1 %vm5104_vm4, %v1089_v38 }
 0x379   : > { %4260 = vmatprep.subr.msk.mxu1 %vm5104_vm4, %v1087_v40 }
 0x37a   : > { %4261 = vmatpush3.msk.msra.mxu1 %vm5104_vm4, %v1087_v40  ;;  %v1085_v9 = vpop.permute.xlu1 %1084 }
 0x37b   : > { %4262 = vmatprep.subr.msk.mxu1 %vm5104_vm4, %v1085_v9 }
 0x37c   : > { %v1083_v19 = vpop.permute.xlu0 %1082  ;;  %4263 = vmatpush3.msk.msra.mxu1 %vm5104_vm4, %v1085_v9 }
 0x37d   : > { %4264 = vmatprep.subr.msk.mxu1 %vm5104_vm4, %v1083_v19 }
 0x37e   : > { %4265 = vmatpush3.msk.msra.mxu1 %vm5104_vm4, %v1083_v19  ;;  %v1081_v20 = vpop.permute.xlu1 %1080 }
 0x37f   : > { %4266 = vmatprep.subr.msk.mxu1 %vm5104_vm4, %v1081_v20 }
 0x380   : > { %v1079_v21 = vpop.permute.xlu0 %1078  ;;  %4267 = vmatpush3.msk.msra.mxu1 %vm5104_vm4, %v1081_v20 }
 0x381   : > { %4268 = vmatprep.subr.msk.mxu1 %vm5104_vm4, %v1079_v21 }
 0x382   : > { %4269 = vmatpush3.msk.msra.mxu1 %vm5104_vm4, %v1079_v21  ;;  %v1077_v22 = vpop.permute.xlu1 %1076 }
 0x383   : > { %4270 = vmatprep.subr.msk.mxu1 %vm5104_vm4, %v1077_v22 }
 0x384   : > { %v1124_v24 = vpop.permute.xlu0 %1123  ;;  %4271 = vmatpush3.msk.msra.mxu1 %vm5104_vm4, %v1077_v22 }
 0x385   : > { %4273 = vmatmul.mubr.msk.f32.vlgmr.msra.gmra.mxu1 %vm1158_vm3, %v1151_v23  ;;  %4284 = vmatprep.subr.mxu1 %v4978_v17 }
 0x386   : > { %4312 = vmatprep.subr.msk.mxu0 %vm4003_vm5, %v1124_v24  ;;  %4285 = vmatpush3.msra.mxu1 %v4978_v17  ;;  %v1122_v6 = vpop.permute.xlu1 %1121 }
 0x387   : > { %4313 = vmatpush3.msk.msra.mxu0 %vm4003_vm5, %v1124_v24  ;;  %4286 = vmatprep.subr.mxu1 %v4982_v18 }
 0x388   : > { %4314 = vmatprep.subr.msk.mxu0 %vm4003_vm5, %v1122_v6  ;;  %v1120_v27 = vpop.permute.xlu0 %1119  ;;  %4275 = vmatprep.mubr.msk.f32.mxu1 %vm1158_vm3, %v1152_v25 }
 0x389   : > { %4287 = vmatpush3.msra.mxu1 %v4982_v18  ;;  %4315 = vmatpush3.msk.msra.mxu0 %vm4003_vm5, %v1122_v6 }
 0x38a   : > { %4276 = vmatmul.mubr.msk.f32.gmra.mxu1 %vm1158_vm3, %v1153_v26  ;;  %4288 = vmatprep.subr.mxu1 %v4974_v12  ;;  %v1118_v17 = vpop.permute.xlu1 %1117 }
 0x38b   : > { %4316 = vmatprep.subr.msk.mxu0 %vm4003_vm5, %v1120_v27  ;;  %4289 = vmatpush3.msra.mxu1 %v4974_v12 }
 0x38c   : > { %4317 = vmatpush3.msk.msra.mxu0 %vm4003_vm5, %v1120_v27  ;;  %4290 = vmatprep.subr.mxu1 %v4976_v16  ;;  %v1116_v18 = vpop.permute.xlu0 %1115 }
 0x38d   : > { %4318 = vmatprep.subr.msk.mxu0 %vm4003_vm5, %v1118_v17  ;;  %4278 = vmatprep.mubr.msk.f32.mxu1 %vm1158_vm3, %v1154_v28 }
 0x38e   : > { %4291 = vmatpush3.msra.mxu1 %v4976_v16  ;;  %4319 = vmatpush3.msk.msra.mxu0 %vm4003_vm5, %v1118_v17  ;;  %v1114_v12 = vpop.permute.xlu1 %1113  ;;  %v1157_v16 = vld [vmem:[%s6225_s5 + $0x38] sm:$0xff] }
 0x38f   : > { %4279 = vmatmul.mubr.msk.f32.gmra.mxu1 %vm1158_vm3, %v1155_v29  ;;  %4292 = vmatprep.subr.mxu1 %v4970_v8 }
 0x390   : > { %4320 = vmatprep.subr.msk.mxu0 %vm4003_vm5, %v1116_v18  ;;  %4293 = vmatpush3.msra.mxu1 %v4970_v8  ;;  %v1112_v31 = vpop.permute.xlu0 %1111 }
 0x391   : > { %4321 = vmatpush3.msk.msra.mxu0 %vm4003_vm5, %v1116_v18  ;;  %4294 = vmatprep.subr.mxu1 %v4972_v11 }
 0x392   : > { %4322 = vmatprep.subr.msk.mxu0 %vm4003_vm5, %v1114_v12  ;;  %4281 = vmatprep.mubr.msk.f32.mxu1 %vm1158_vm3, %v1156_v30  ;;  %v1110_v8 = vpop.permute.xlu1 %1109 }
 0x393   : > { %4295 = vmatpush3.msra.mxu1 %v4972_v11  ;;  %4323 = vmatpush3.msk.msra.mxu0 %vm4003_vm5, %v1114_v12  ;;  %v3761_v11 = vld [vmem:[%s6225_s5 + $0x48] sm:$0xff] }
 0x394   : > { %4282 = vmatmul.mubr.msk.f32.gmra.mxu1 %vm1158_vm3, %v1157_v16  ;;  %4296 = vmatprep.subr.mxu1 %v4966_v10 }
 0x395   : > { %4324 = vmatprep.subr.msk.mxu0 %vm4003_vm5, %v1112_v31  ;;  %4297 = vmatpush3.msra.mxu1 %v4966_v10  ;;  %v3762_v10 = vld [vmem:[%s6225_s5 + $0x50] sm:$0xff] }
 0x396   : > { %4325 = vmatpush3.msk.msra.mxu0 %vm4003_vm5, %v1112_v31  ;;  %4298 = vmatprep.subr.mxu1 %v4968_v7 }
 0x397   : > { %4326 = vmatprep.subr.msk.mxu0 %vm4003_vm5, %v1110_v8  ;;  %4299 = vmatpush3.msra.mxu1 %v4968_v7  ;;  %v3763_v7 = vld [vmem:[%s6225_s5 + $0x58] sm:$0xff] }
 0x398   : > { %4300 = vmatprep.mubr.msk.f32.mxu1 %vm1158_vm3, %v3760_v32  ;;  %4327 = vmatpush3.msk.msra.mxu0 %vm4003_vm5, %v1110_v8 }
 0x399   : > { %4301 = vmatmul.mubr.msk.f32.vlgmr.msra.gmra.mxu1 %vm1158_vm3, %v3761_v11  ;;  %4329 = vmatmul.mubr.msk.f32.vlgmr.msra.gmra.mxu0 %vm1158_vm3, %v3801_v33 }
 0x39a   : > { %4303 = vmatprep.mubr.msk.f32.mxu1 %vm1158_vm3, %v3762_v10  ;;  %4331 = vmatprep.mubr.msk.f32.mxu0 %vm1158_vm3, %v3802_v34 }
 0x39d   : > { %4304 = vmatmul.mubr.msk.f32.gmra.mxu1 %vm1158_vm3, %v3763_v7  ;;  %4332 = vmatmul.mubr.msk.f32.gmra.mxu0 %vm1158_vm3, %v3803_v36  ;;  %v1574_v48 = vpop.permute.xlu0 %1573 }
 0x39e   : > { %4306 = vmatprep.mubr.msk.f32.mxu1 %vm1158_vm3, %v3764_v37  ;;  %4334 = vmatprep.mubr.msk.f32.mxu0 %vm1158_vm3, %v3804_v41 }
 0x39f   : > { %v1579_v47 = vpop.permute.xlu1 %1578 }
 0x3a1   : > { %4307 = vmatmul.mubr.msk.f32.gmra.mxu1 %vm1158_vm3, %v3765_v42  ;;  %4335 = vmatmul.mubr.msk.f32.gmra.mxu0 %vm1158_vm3, %v3805_v43  ;;  %v1630_v51 = vpop.permute.xlu0 %1629 }
 0x3a2   : > { %4309 = vmatprep.mubr.msk.f32.mxu1 %vm1158_vm3, %v3766_v44  ;;  %4337 = vmatprep.mubr.msk.f32.mxu0 %vm1158_vm3, %v3806_v45 }
 0x3a3   : > { %v1635_v49 = vpop.permute.xlu1 %1634 }
 0x3a5   : > { %4310 = vmatmul.mubr.msk.f32.gmra.mxu1 %vm1158_vm3, %v3767_v13  ;;  %4338 = vmatmul.mubr.msk.f32.gmra.mxu0 %vm1158_vm3, %v3807_v46  ;;  %v1584_v54 = vpop.permute.xlu0 %1583 }
 0x3a7   : > { %v1589_v52 = vpop.permute.xlu1 %1588 }
 0x3a9   : > { %v1640_v58 = vpop.permute.xlu0 %1639 }
 0x3ab   : > { %v1645_v57 = vpop.permute.xlu1 %1644 }
 0x3ad   : > { %v1594_v0 = vpop.permute.xlu0 %1593 }
 0x3af   : > { %v1599_v61 = vpop.permute.xlu1 %1598 }
 0x3b1   : > { %v1650_v24 = vpop.permute.xlu0 %1649 }
 0x3b3   : > { %v1655_v9 = vpop.permute.xlu1 %1654 }
 0x3b5   : > { %v1604_v45 = vpop.permute.xlu0 %1603 }
 0x3b7   : > { %v1609_v32 = vpop.permute.xlu1 %1608 }
 0x445   : > { %v4274_v14 = vpop.f32.mrf.mxu1 }
 0x447   : > { %v1249_v50 = vpop.f32.mrf.mxu1 }
 0x44a   : > { %v4277_v15 = vpop.f32.mrf.mxu1 }
 0x44c   : > { %v1259_v53 = vpop.f32.mrf.mxu1 }
 0x44f   : > { %v4280_v55 = vpop.f32.mrf.mxu1 }
 0x451   : > { %v1269_v56 = vpop.f32.mrf.mxu1 }
 0x454   : > { %v4283_v59 = vpop.f32.mrf.mxu1 }
 0x456   : > { %v1279_v60 = vpop.f32.mrf.mxu1 }
 0x459   : > { %v4302_v62 = vpop.f32.mrf.mxu1  ;;  %v4330_v63 = vpop.f32.mrf.mxu0 }
 0x45a   : > { %v1384_v2 = vadd.f32 %v4302_v62, %v4274_v14 }
 0x45b   : > { %v1378_v3 = vpop.f32.mrf.mxu1  ;;  %v1516_v4 = vpop.f32.mrf.mxu0 }
 0x45c   : > { %v1556_v5 = vadd.f32 %v4330_v63, %v1384_v2  ;;  %v1379_v39 = vadd.f32 %v1378_v3, %v1249_v50 }
 0x45d   : > { %v4305_v38 = vpop.f32.mrf.mxu1  ;;  %v4333_v40 = vpop.f32.mrf.mxu0 }
 0x45e   : > { %v1612_v19 = vmul.f32 %v1579_v47, %v1556_v5  ;;  %v1555_v20 = vadd.f32 %v1516_v4, %v1379_v39  ;;  %v1394_v21 = vadd.f32 %v4305_v38, %v4277_v15  ;;  %v1778_v5 = vld [vmem:[%s6228_s8 + $0x38] sm:$0xff]  ;;  %v1777_v39 = vld [vmem:[%s6228_s8 + $0x30] sm:$0xff] }
 0x45f   : > { %v1388_v22 = vpop.f32.mrf.mxu1  ;;  %v1526_v23 = vpop.f32.mrf.mxu0  ;;  %4340 = vmatprep.subr.mxu1 %v1778_v5 }
 0x460   : > { %v1668_v25 = vadd.f32 %v1635_v49, %v1612_v19  ;;  %v1611_v6 = vmul.f32 %v1574_v48, %v1555_v20  ;;  %v1558_v26 = vadd.f32 %v4333_v40, %v1394_v21  ;;  %v1389_v27 = vadd.f32 %v1388_v22, %v1259_v53  ;;  %4341 = vmatpush3.msra.mxu1 %v1778_v5  ;;  %v1775_v20 = vld [vmem:[%s6228_s8 + $0x20] sm:$0xff] }
 0x461   : > { %v4308_v17 = vpop.f32.mrf.mxu1  ;;  %v4336_v28 = vpop.f32.mrf.mxu0  ;;  %4342 = vmatprep.subr.mxu1 %v1777_v39 }
 0x462   : > { %v5277_v18 = vmax.f32 %v1668_v25, 0.0  ;;  %v1667_v29 = vadd.f32 %v1630_v51, %v1611_v6  ;;  %v1614_v12 = vmul.f32 %v1589_v52, %v1558_v26  ;;  %v1557_v30 = vadd.f32 %v1526_v23, %v1389_v27  ;;  %4343 = vmatpush3.msra.mxu1 %v1777_v39  ;;  %v1773_v6 = vld [vmem:[%s6228_s8 + $0x10] sm:$0xff] }
 0x463   : > { %v1404_v16 = vadd.f32 %v4308_v17, %v4280_v55  ;;  %v1398_v31 = vpop.f32.mrf.mxu1  ;;  %v1536_v8 = vpop.f32.mrf.mxu0 }
 0x464   : > { %v5279_v11 = vmax.f32 %v1667_v29, 0.0  ;;  %v1670_v33 = vadd.f32 %v1645_v57, %v1614_v12  ;;  %v1613_v10 = vmul.f32 %v1584_v54, %v1557_v30  ;;  %v1399_v34 = vadd.f32 %v1398_v31, %v1269_v56  ;;  %1686 = vrot.lane.b32.xlu1 %v5277_v18, %s4622_s1  ;;  %v1665_v54 = vpop.permute.xlu1 %1664  ;;  %v1772_v29 = vld [vmem:[%s6228_s8 + $0x8] sm:$0xff]  ;;  %v1771_v12 = vld [vmem:[%s6228_s8] sm:$0xff] }
 0x465   : > { %v1560_v7 = vadd.f32 %v4336_v28, %v1404_v16  ;;  %v4311_v36 = vpop.f32.mrf.mxu1  ;;  %v4339_v37 = vpop.f32.mrf.mxu0 }
 0x466   : > { %v5283_v41 = vmax.f32 %v1670_v33, 0.0  ;;  %v1669_v42 = vadd.f32 %v1640_v58, %v1613_v10  ;;  %v1559_v43 = vadd.f32 %v1536_v8, %v1399_v34  ;;  %v1414_v44 = vadd.f32 %v4311_v36, %v4283_v59  ;;  %1683 = vrot.lane.b32.xlu0 %v5279_v11, %s4622_s1  ;;  %v1660_v59 = vpop.permute.xlu0 %1659 }
 0x467   : > { %v1616_v13 = vmul.f32 %v1599_v61, %v1560_v7  ;;  %v1408_v46 = vpop.f32.mrf.mxu1  ;;  %v1546_v51 = vpop.f32.mrf.mxu0 }
 0x468   : > { %v5287_v47 = vmax.f32 %v1669_v42, 0.0  ;;  %v1615_v48 = vmul.f32 %v1594_v0, %v1559_v43  ;;  %v1562_v14 = vadd.f32 %v4339_v37, %v1414_v44  ;;  %v1409_v49 = vadd.f32 %v1408_v46, %v1279_v60  ;;  %1692 = vrot.lane.b32.xlu1 %v5283_v41, %s4622_s1 }
 0x469   : > { %v1672_v50 = vadd.f32 %v1655_v9, %v1616_v13  ;;  %v1776_v9 = vld [vmem:[%s6228_s8 + $0x28] sm:$0xff] }
 0x46a   : > { %v1671_v15 = vadd.f32 %v1650_v24, %v1615_v48  ;;  %v1618_v52 = vmul.f32 %v1609_v32, %v1562_v14  ;;  %v1561_v53 = vadd.f32 %v1546_v51, %v1409_v49  ;;  %1689 = vrot.lane.b32.xlu0 %v5287_v47, %s4622_s1  ;;  %4344 = vmatprep.subr.mxu1 %v1776_v9  ;;  %v1774_v24 = vld [vmem:[%s6228_s8 + $0x18] sm:$0xff] }
 0x46b   : > { %v5293_v55 = vmax.f32 %v1672_v50, 0.0  ;;  %4345 = vmatpush3.msra.mxu1 %v1776_v9 }
 0x46c   : > { %v5295_v56 = vmax.f32 %v1671_v15, 0.0  ;;  %v1674_v57 = vadd.f32 %v1665_v54, %v1618_v52  ;;  %v1617_v58 = vmul.f32 %v1604_v45, %v1561_v53  ;;  %4346 = vmatprep.subr.mxu1 %v1775_v20 }
 0x46d   : > { %1698 = vrot.lane.b32.xlu1 %v5293_v55, %s4622_s1  ;;  %4347 = vmatpush3.msra.mxu1 %v1775_v20 }
 0x46e   : > { %v5299_v60 = vmax.f32 %v1674_v57, 0.0  ;;  %v1673_v61 = vadd.f32 %v1660_v59, %v1617_v58  ;;  %1695 = vrot.lane.b32.xlu0 %v5295_v56, %s4622_s1  ;;  %4348 = vmatprep.subr.mxu1 %v1774_v24 }
 0x46f   : > { %4349 = vmatpush3.msra.mxu1 %v1774_v24 }
 0x470   : > { %v5303_v62 = vmax.f32 %v1673_v61, 0.0  ;;  %4350 = vmatprep.subr.mxu1 %v1773_v6 }
 0x471   : > { %1704 = vrot.lane.b32.xlu1 %v5299_v60, %s4622_s1  ;;  %4351 = vmatpush3.msra.mxu1 %v1773_v6 }
 0x472   : > { %1701 = vrot.lane.b32.xlu0 %v5303_v62, %s4622_s1  ;;  %4352 = vmatprep.subr.mxu1 %v1772_v29 }
 0x473   : > { %4353 = vmatpush3.msra.mxu1 %v1772_v29  ;;  %v2039_v29 = vld [vmem:[%s6229_s9] sm:$0xff] }
 0x474   : > { %4354 = vmatprep.subr.mxu1 %v1771_v12  ;;  %4384 = vmatprep.mubr.msk.f32.mxu0 %vm1158_vm3, %v2039_v29  ;;  %v3882_v29 = vld [vmem:[%s6229_s9 + $0x90] sm:$0xff] }
 0x475   : > { %4355 = vmatpush3.msra.mxu1 %v1771_v12  ;;  %v3840_v12 = vld [vmem:[%s6229_s9 + $0x40] sm:$0xff] }
 0x4d6   : > { %v1687_v63 = vpop.permute.xlu1 %1686 }
 0x4d7   : > { %v1688_v0 = vsel %vm1019_vm2, %v1687_v63, %v5277_v18 }
 0x4d8   : > { %v1684_v2 = vpop.permute.xlu0 %1683  ;;  %1709 = vrot.lane.b32.xlu1 %v1688_v0, %s4622_s1 }
 0x4d9   : > { %v1685_v3 = vsel %vm1019_vm2, %v1684_v2, %v5279_v11 }
 0x4da   : > { %1707 = vrot.lane.b32.xlu0 %v1685_v3, %s4622_s1  ;;  %v1693_v4 = vpop.permute.xlu1 %1692 }
 0x4db   : > { %v1694_v38 = vsel %vm1019_vm2, %v1693_v4, %v5283_v41 }
 0x4dc   : > { %v1690_v40 = vpop.permute.xlu0 %1689  ;;  %1713 = vrot.lane.b32.xlu1 %v1694_v38, %s4622_s1 }
 0x4dd   : > { %v1691_v19 = vsel %vm1019_vm2, %v1690_v40, %v5287_v47 }
 0x4de   : > { %1711 = vrot.lane.b32.xlu0 %v1691_v19, %s4622_s1 }
 0x4df   : > { %v1699_v21 = vpop.permute.xlu1 %1698 }
 0x4e0   : > { %v1700_v22 = vsel %vm1019_vm2, %v1699_v21, %v5293_v55  ;;  %v1696_v23 = vpop.permute.xlu0 %1695 }
 0x4e1   : > { %v1697_v25 = vsel %vm1019_vm2, %v1696_v23, %v5295_v56  ;;  %1717 = vrot.lane.b32.xlu1 %v1700_v22, %s4622_s1 }
 0x4e2   : > { %1715 = vrot.lane.b32.xlu0 %v1697_v25, %s4622_s1 }
 0x4e3   : > { %v1705_v26 = vpop.permute.xlu1 %1704 }
 0x4e4   : > { %v1706_v27 = vsel %vm1019_vm2, %v1705_v26, %v5299_v60  ;;  %v1702_v17 = vpop.permute.xlu0 %1701 }
 0x4e5   : > { %v1703_v28 = vsel %vm1019_vm2, %v1702_v17, %v5303_v62  ;;  %1721 = vrot.lane.b32.xlu1 %v1706_v27, %s4622_s1 }
 0x4e6   : > { %1719 = vrot.lane.b32.xlu0 %v1703_v28, %s4622_s1  ;;  %s4624_s1 = smov 32  }
 0x54a   : > { %v1710_v30 = vpop.permute.xlu1 %1709 }
 0x54b   : > { %v1724_v16 = vsel %vm1019_vm2, %v1710_v30, %v5277_v18 }
 0x54c   : > { %v1708_v31 = vpop.permute.xlu0 %1707  ;;  %1741 = vrot.lane.b32.xlu1 %v1724_v16, %s4621_s18 }
 0x54d   : > { %v1723_v8 = vsel %vm1019_vm2, %v1708_v31, %v5279_v11  ;;  %v3841_v31 = vld [vmem:[%s6229_s9 + $0x48] sm:$0xff] }
 0x54e   : > { %1739 = vrot.lane.b32.xlu0 %v1723_v8, %s4621_s18  ;;  %v1714_v32 = vpop.permute.xlu1 %1713 }
 0x54f   : > { %v1726_v33 = vsel %vm1019_vm2, %v1714_v32, %v5283_v41 }
 0x550   : > { %v1712_v10 = vpop.permute.xlu0 %1711  ;;  %1745 = vrot.lane.b32.xlu1 %v1726_v33, %s4621_s18 }
 0x551   : > { %v1725_v34 = vsel %vm1019_vm2, %v1712_v10, %v5287_v47  ;;  %v3842_v10 = vld [vmem:[%s6229_s9 + $0x50] sm:$0xff] }
 0x552   : > { %1743 = vrot.lane.b32.xlu0 %v1725_v34, %s4621_s18 }
 0x553   : > { %v1718_v7 = vpop.permute.xlu1 %1717 }
 0x554   : > { %v1728_v36 = vsel %vm1019_vm2, %v1718_v7, %v5293_v55  ;;  %v1716_v37 = vpop.permute.xlu0 %1715  ;;  %v3843_v7 = vld [vmem:[%s6229_s9 + $0x58] sm:$0xff] }
 0x555   : > { %v1727_v42 = vsel %vm1019_vm2, %v1716_v37, %v5295_v56  ;;  %1749 = vrot.lane.b32.xlu1 %v1728_v36, %s4621_s18 }
 0x556   : > { %1747 = vrot.lane.b32.xlu0 %v1727_v42, %s4621_s18 }
 0x557   : > { %v1722_v43 = vpop.permute.xlu1 %1721 }
 0x558   : > { %v1730_v44 = vsel %vm1019_vm2, %v1722_v43, %v5299_v60  ;;  %v1720_v45 = vpop.permute.xlu0 %1719  ;;  %v3844_v43 = vld [vmem:[%s6229_s9 + $0x60] sm:$0xff] }
 0x559   : > { %v1729_v13 = vsel %vm1019_vm2, %v1720_v45, %v5303_v62  ;;  %1753 = vrot.lane.b32.xlu1 %v1730_v44, %s4621_s18  ;;  %v3845_v45 = vld [vmem:[%s6229_s9 + $0x68] sm:$0xff] }
 0x55a   : > { %1751 = vrot.lane.b32.xlu0 %v1729_v13, %s4621_s18 }
 0x5be   : > { %v1742_v46 = vpop.permute.xlu1 %1741 }
 0x5bf   : > { %v1764_v49 = vmax.f32 %v5277_v18, %v1742_v46 }
 0x5c0   : > { %v1740_v48 = vpop.permute.xlu0 %1739 }
 0x5c1   : > { %v1763_v14 = vmax.f32 %v5279_v11, %v1740_v48  ;;  %v3846_v48 = vld [vmem:[%s6229_s9 + $0x70] sm:$0xff] }
 0x5c2   : > { %v1746_v50 = vpop.permute.xlu1 %1745 }
 0x5c3   : > { %4356 = vmatprep.mubr.msk.f32.mxu1 %vm1158_vm3, %v1763_v14  ;;  %v1766_v52 = vmax.f32 %v5283_v41, %v1746_v50  ;;  %v3847_v14 = vld [vmem:[%s6229_s9 + $0x78] sm:$0xff]  ;;  %v2452_v50 = vld [vmem:[%s6230_s10 + $0x8] sm:$0xff] }
 0x5c4   : > { %v1744_v51 = vpop.permute.xlu0 %1743  ;;  %4357 = vmatmul.mubr.msk.f32.vlgmr.msra.gmra.mxu1 %vm1158_vm3, %v1764_v49  ;;  %v2451_v49 = vld [vmem:[%s6230_s10] sm:$0xff] }
 0x5c5   : > { %v1765_v15 = vmax.f32 %v5287_v47, %v1744_v51  ;;  %v2507_v51 = vld [vmem:[%s6231_s11] sm:$0xff] }
 0x5c7   : > { %v1750_v53 = vpop.permute.xlu1 %1749  ;;  %4359 = vmatprep.mubr.msk.f32.mxu1 %vm1158_vm3, %v1765_v15  ;;  %v2508_v15 = vld [vmem:[%s6231_s11 + $0x8] sm:$0xff] }
 0x5c8   : > { %v1748_v54 = vpop.permute.xlu0 %1747  ;;  %4360 = vmatmul.mubr.msk.f32.gmra.mxu1 %vm1158_vm3, %v1766_v52  ;;  %v1768_v18 = vmax.f32 %v5293_v55, %v1750_v53  ;;  %v2453_v52 = vld [vmem:[%s6230_s10 + $0x10] sm:$0xff]  ;;  %v2454_v53 = vld [vmem:[%s6230_s10 + $0x18] sm:$0xff] }
 0x5c9   : > { %v1767_v11 = vmax.f32 %v5295_v56, %v1748_v54  ;;  %v2509_v54 = vld [vmem:[%s6231_s11 + $0x10] sm:$0xff] }
 0x5cb   : > { %v1754_v57 = vpop.permute.xlu1 %1753  ;;  %4362 = vmatprep.mubr.msk.f32.mxu1 %vm1158_vm3, %v1767_v11  ;;  %v2510_v11 = vld [vmem:[%s6231_s11 + $0x18] sm:$0xff] }
 0x5cc   : > { %v1752_v58 = vpop.permute.xlu0 %1751  ;;  %4363 = vmatmul.mubr.msk.f32.gmra.mxu1 %vm1158_vm3, %v1768_v18  ;;  %v1770_v41 = vmax.f32 %v5299_v60, %v1754_v57  ;;  %v2455_v18 = vld [vmem:[%s6230_s10 + $0x20] sm:$0xff]  ;;  %v2456_v57 = vld [vmem:[%s6230_s10 + $0x28] sm:$0xff] }
 0x5cd   : > { %v1769_v47 = vmax.f32 %v5303_v62, %v1752_v58  ;;  %v2511_v58 = vld [vmem:[%s6231_s11 + $0x20] sm:$0xff] }
 0x5cf   : > { %4365 = vmatprep.mubr.msk.f32.mxu1 %vm1158_vm3, %v1769_v47  ;;  %v2512_v47 = vld [vmem:[%s6231_s11 + $0x28] sm:$0xff] }
 0x5d0   : > { %4366 = vmatmul.mubr.msk.f32.gmra.mxu1 %vm1158_vm3, %v1770_v41  ;;  %v2457_v41 = vld [vmem:[%s6230_s10 + $0x30] sm:$0xff] }
 0x5d1   : > { %4412 = vmatprep.mubr.msk.f32.mxu1 %vm1158_vm3, %v3840_v12  ;;  %v3883_v12 = vld [vmem:[%s6229_s9 + $0x98] sm:$0xff] }
 0x684   : > { %v5397_v59 = vpop.f32.mrf.mxu1 }
 0x686   : > { %v5399_v61 = vpop.f32.mrf.mxu1 }
 0x688   : > { %v5401_v56 = vpop.f32.mrf.mxu1 }
 0x68a   : > { %v5403_v55 = vpop.f32.mrf.mxu1 }
 0x68c   : > { %v5405_v63 = vpop.f32.mrf.mxu1 }
 0x68e   : > { %v5407_v0 = vpop.f32.mrf.mxu1 }
 0x690   : > { %v4367_v2 = vpop.f32.mrf.mxu1 }
 0x691   : > { %1930 = vrot.lane.b32.xlu0 %v4367_v2, %s4624_s1  ;;  %4396 = vmatprep.subr.mxu1 %v4367_v2 }
 0x692   : > { %v1899_v60 = vpop.f32.mrf.mxu1  ;;  %4397 = vmatpush3.msra.mxu1 %v4367_v2 }
 0x693   : > { %1927 = vrot.lane.b32.xlu1 %v1899_v60, %s4624_s1  ;;  %4398 = vmatprep.subr.mxu1 %v1899_v60 }
 0x694   : > { %4399 = vmatpush3.msra.mxu1 %v1899_v60 }
 0x695   : > { %1924 = vrot.lane.b32.xlu0 %v5405_v63, %s4624_s1  ;;  %4400 = vmatprep.subr.mxu1 %v5405_v63 }
 0x696   : > { %4401 = vmatpush3.msra.mxu1 %v5405_v63 }
 0x697   : > { %1921 = vrot.lane.b32.xlu1 %v5407_v0, %s4624_s1  ;;  %4402 = vmatprep.subr.mxu1 %v5407_v0 }
 0x698   : > { %4403 = vmatpush3.msra.mxu1 %v5407_v0 }
 0x699   : > { %1918 = vrot.lane.b32.xlu0 %v5401_v56, %s4624_s1  ;;  %4404 = vmatprep.subr.mxu1 %v5401_v56 }
 0x69a   : > { %4405 = vmatpush3.msra.mxu1 %v5401_v56 }
 0x69b   : > { %1915 = vrot.lane.b32.xlu1 %v5403_v55, %s4624_s1  ;;  %4406 = vmatprep.subr.mxu1 %v5403_v55 }
 0x69c   : > { %4407 = vmatpush3.msra.mxu1 %v5403_v55 }
 0x69d   : > { %1912 = vrot.lane.b32.xlu0 %v5397_v59, %s4624_s1  ;;  %4408 = vmatprep.subr.mxu1 %v5397_v59 }
 0x69e   : > { %4409 = vmatpush3.msra.mxu1 %v5397_v59 }
 0x69f   : > { %1909 = vrot.lane.b32.xlu1 %v5399_v61, %s4624_s1  ;;  %4410 = vmatprep.subr.mxu1 %v5399_v61 }
 0x6a0   : > { %4411 = vmatpush3.msra.mxu1 %v5399_v61 }
 0x6a1   : > { %4413 = vmatmul.mubr.msk.f32.vlgmr.msra.gmra.mxu1 %vm1158_vm3, %v3841_v31  ;;  %v3886_v31 = vld [vmem:[%s6229_s9 + $0xb0] sm:$0xff] }
 0x6a2   : > { %4415 = vmatprep.mubr.msk.f32.mxu1 %vm1158_vm3, %v3842_v10 }
 0x6a5   : > { %4416 = vmatmul.mubr.msk.f32.gmra.mxu1 %vm1158_vm3, %v3843_v7 }
 0x6a6   : > { %4418 = vmatprep.mubr.msk.f32.mxu1 %vm1158_vm3, %v3844_v43 }
 0x6a9   : > { %4419 = vmatmul.mubr.msk.f32.gmra.mxu1 %vm1158_vm3, %v3845_v45 }
 0x6aa   : > { %4421 = vmatprep.mubr.msk.f32.mxu1 %vm1158_vm3, %v3846_v48 }
 0x6ad   : > { %4422 = vmatmul.mubr.msk.f32.gmra.mxu1 %vm1158_vm3, %v3847_v14 }
 0x703   : > { %v1931_v62 = vpop.permute.xlu0 %1930 }
 0x704   : > { %v1932_v3 = vsel %vm1908_vm6, %v1931_v62, %v4367_v2 }
 0x705   : > { %1947 = vrot.lane.b32.xlu0 %v1932_v3, %s4624_s1  ;;  %v1928_v4 = vpop.permute.xlu1 %1927 }
 0x706   : > { %v1929_v5 = vsel %vm1908_vm6, %v1928_v4, %v1899_v60 }
 0x707   : > { %v1925_v39 = vpop.permute.xlu0 %1924  ;;  %1945 = vrot.lane.b32.xlu1 %v1929_v5, %s4624_s1  ;;  %v2040_v5 = vld [vmem:[%s6229_s9 + $0x8] sm:$0xff] }
 0x708   : > { %v1926_v38 = vsel %vm1908_vm6, %v1925_v39, %v5405_v63  ;;  %v2041_v39 = vld [vmem:[%s6229_s9 + $0x10] sm:$0xff] }
 0x709   : > { %1943 = vrot.lane.b32.xlu0 %v1926_v38, %s4624_s1  ;;  %v1922_v40 = vpop.permute.xlu1 %1921 }
 0x70a   : > { %v1923_v9 = vsel %vm1908_vm6, %v1922_v40, %v5407_v0 }
 0x70b   : > { %v1919_v19 = vpop.permute.xlu0 %1918  ;;  %1941 = vrot.lane.b32.xlu1 %v1923_v9, %s4624_s1  ;;  %v2042_v9 = vld [vmem:[%s6229_s9 + $0x18] sm:$0xff] }
 0x70c   : > { %v1920_v20 = vsel %vm1908_vm6, %v1919_v19, %v5401_v56  ;;  %v2043_v19 = vld [vmem:[%s6229_s9 + $0x20] sm:$0xff] }
 0x70d   : > { %1939 = vrot.lane.b32.xlu0 %v1920_v20, %s4624_s1  ;;  %v1916_v21 = vpop.permute.xlu1 %1915 }
 0x70e   : > { %v1917_v22 = vsel %vm1908_vm6, %v1916_v21, %v5403_v55 }
 0x70f   : > { %v1913_v23 = vpop.permute.xlu0 %1912  ;;  %1937 = vrot.lane.b32.xlu1 %v1917_v22, %s4624_s1  ;;  %v2044_v22 = vld [vmem:[%s6229_s9 + $0x28] sm:$0xff] }
 0x710   : > { %v1914_v24 = vsel %vm1908_vm6, %v1913_v23, %v5397_v59  ;;  %v2045_v23 = vld [vmem:[%s6229_s9 + $0x30] sm:$0xff] }
 0x711   : > { %1935 = vrot.lane.b32.xlu0 %v1914_v24, %s4624_s1  ;;  %v1910_v25 = vpop.permute.xlu1 %1909 }
 0x712   : > { %v1911_v6 = vsel %vm1908_vm6, %v1910_v25, %v5399_v61 }
 0x713   : > { %1933 = vrot.lane.b32.xlu1 %v1911_v6, %s4624_s1  ;;  %v2046_v6 = vld [vmem:[%s6229_s9 + $0x38] sm:$0xff] }
 0x777   : > { %v1948_v26 = vpop.permute.xlu0 %1947 }
 0x778   : > { %v1956_v27 = vsel %vm1908_vm6, %v1948_v26, %v4367_v2  ;;  %v3880_v26 = vld [vmem:[%s6229_s9 + $0x80] sm:$0xff] }
 0x779   : > { %1979 = vrot.lane.b32.xlu0 %v1956_v27, %s4625_s0  ;;  %v1946_v17 = vpop.permute.xlu1 %1945 }
 0x77a   : > { %v1955_v28 = vsel %vm1908_vm6, %v1946_v17, %v1899_v60 }
 0x77b   : > { %v1944_v30 = vpop.permute.xlu0 %1943  ;;  %1977 = vrot.lane.b32.xlu1 %v1955_v28, %s4625_s0 }
 0x77c   : > { %v1954_v16 = vsel %vm1908_vm6, %v1944_v30, %v5405_v63  ;;  %v3884_v30 = vld [vmem:[%s6229_s9 + $0xa0] sm:$0xff] }
 0x77d   : > { %1975 = vrot.lane.b32.xlu0 %v1954_v16, %s4625_s0  ;;  %v1942_v8 = vpop.permute.xlu1 %1941 }
 0x77e   : > { %v1953_v32 = vsel %vm1908_vm6, %v1942_v8, %v5407_v0  ;;  %v3887_v8 = vld [vmem:[%s6229_s9 + $0xb8] sm:$0xff] }
 0x77f   : > { %v1940_v33 = vpop.permute.xlu0 %1939  ;;  %1973 = vrot.lane.b32.xlu1 %v1953_v32, %s4625_s0 }
 0x780   : > { %v1952_v34 = vsel %vm1908_vm6, %v1940_v33, %v5401_v56  ;;  %v2514_v56 = vld [vmem:[%s6231_s11 + $0x38] sm:$0xff] }
 0x781   : > { %1971 = vrot.lane.b32.xlu0 %v1952_v34, %s4625_s0  ;;  %v1938_v36 = vpop.permute.xlu1 %1937 }
 0x782   : > { %v1951_v37 = vsel %vm1908_vm6, %v1938_v36, %v5403_v55 }
 0x783   : > { %v1936_v42 = vpop.permute.xlu0 %1935  ;;  %1969 = vrot.lane.b32.xlu1 %v1951_v37, %s4625_s0 }
 0x784   : > { %v1950_v44 = vsel %vm1908_vm6, %v1936_v42, %v5397_v59  ;;  %v2458_v59 = vld [vmem:[%s6230_s10 + $0x38] sm:$0xff] }
 0x785   : > { %1967 = vrot.lane.b32.xlu0 %v1950_v44, %s4625_s0  ;;  %v1934_v13 = vpop.permute.xlu1 %1933 }
 0x786   : > { %v1949_v46 = vsel %vm1908_vm6, %v1934_v13, %v5399_v61  ;;  %v2513_v61 = vld [vmem:[%s6231_s11 + $0x30] sm:$0xff] }
 0x787   : > { %1965 = vrot.lane.b32.xlu1 %v1949_v46, %s4625_s0  ;;  %s4627_s0 = smov 113  }
 0x789   : > { %2012 = vrot.lane.b32.xlu0 %v1956_v27, %s4621_s18 }
 0x78b   : > { %2010 = vrot.lane.b32.xlu1 %v1955_v28, %s4621_s18  ;;  %v3881_v28 = vld [vmem:[%s6229_s9 + $0x88] sm:$0xff] }
 0x78d   : > { %2008 = vrot.lane.b32.xlu0 %v1954_v16, %s4621_s18  ;;  %v3885_v16 = vld [vmem:[%s6229_s9 + $0xa8] sm:$0xff] }
 0x78f   : > { %2006 = vrot.lane.b32.xlu1 %v1953_v32, %s4621_s18 }
 0x791   : > { %2004 = vrot.lane.b32.xlu0 %v1952_v34, %s4621_s18  ;;  %v4414_v34 = vpop.f32.mrf.mxu1 }
 0x793   : > { %2002 = vrot.lane.b32.xlu1 %v1951_v37, %s4621_s18  ;;  %v2266_v37 = vpop.f32.mrf.mxu1 }
 0x795   : > { %2000 = vrot.lane.b32.xlu0 %v1950_v44, %s4621_s18  ;;  %v4417_v13 = vpop.f32.mrf.mxu1 }
 0x797   : > { %1998 = vrot.lane.b32.xlu1 %v1949_v46, %s4621_s18 }
 0x799   : > { %2461 = vperm.xlu0 %4589, %v2451_v49   ;;  %v2276_v49 = vpop.f32.mrf.mxu1 }
 0x79b   : > { %2466 = vperm.xlu1 %4590, %v2452_v50  }
 0x79d   : > { %2517 = vperm.xlu0 %4589, %v2507_v51  }
 0x79f   : > { %2522 = vperm.xlu1 %4590, %v2508_v15  }
 0x7a1   : > { %2471 = vperm.xlu0 %4589, %v2453_v52   ;;  %v4420_v52 = vpop.f32.mrf.mxu1 }
 0x7a3   : > { %2476 = vperm.xlu1 %4590, %v2454_v53  }
 0x7a5   : > { %2527 = vperm.xlu0 %4589, %v2509_v54  }
 0x7a7   : > { %2532 = vperm.xlu1 %4590, %v2510_v11  }
 0x7a9   : > { %2481 = vperm.xlu0 %4589, %v2455_v18  }
 0x7ab   : > { %2486 = vperm.xlu1 %4590, %v2456_v57  }
 0x7ad   : > { %2537 = vperm.xlu0 %4589, %v2511_v58  }
 0x7af   : > { %2542 = vperm.xlu1 %4590, %v2512_v47   ;;  %v2286_v47 = vpop.f32.mrf.mxu1 }
 0x7b1   : > { %2491 = vperm.xlu0 %4589, %v2457_v41  }
 0x7b3   : > { %2496 = vperm.xlu1 %4590, %v2458_v59  }
 0x7b5   : > { %2547 = vperm.xlu0 %4589, %v2513_v61  }
 0x7b7   : > { %2552 = vperm.xlu1 %4590, %v2514_v56  }
 0x7eb   : > { %v1980_v55 = vpop.permute.xlu0 %1979 }
 0x7ec   : > { %4368 = vmatprep.subr.msk.mxu0 %vm5104_vm4, %v1980_v55 }
 0x7ed   : > { %4369 = vmatpush3.msk.msra.mxu0 %vm5104_vm4, %v1980_v55  ;;  %v1978_v63 = vpop.permute.xlu1 %1977 }
 0x7ee   : > { %4370 = vmatprep.subr.msk.mxu0 %vm5104_vm4, %v1978_v63 }
 0x7ef   : > { %v1976_v0 = vpop.permute.xlu0 %1975  ;;  %4371 = vmatpush3.msk.msra.mxu0 %vm5104_vm4, %v1978_v63 }
 0x7f0   : > { %4372 = vmatprep.subr.msk.mxu0 %vm5104_vm4, %v1976_v0 }
 0x7f1   : > { %4373 = vmatpush3.msk.msra.mxu0 %vm5104_vm4, %v1976_v0  ;;  %v1974_v2 = vpop.permute.xlu1 %1973 }
 0x7f2   : > { %4374 = vmatprep.subr.msk.mxu0 %vm5104_vm4, %v1974_v2 }
 0x7f3   : > { %v1972_v60 = vpop.permute.xlu0 %1971  ;;  %4375 = vmatpush3.msk.msra.mxu0 %vm5104_vm4, %v1974_v2 }
 0x7f4   : > { %4376 = vmatprep.subr.msk.mxu0 %vm5104_vm4, %v1972_v60 }
 0x7f5   : > { %4377 = vmatpush3.msk.msra.mxu0 %vm5104_vm4, %v1972_v60  ;;  %v1970_v62 = vpop.permute.xlu1 %1969  ;;  %v4423_v60 = vpop.f32.mrf.mxu1 }
 0x7f6   : > { %4378 = vmatprep.subr.msk.mxu0 %vm5104_vm4, %v1970_v62 }
 0x7f7   : > { %v1968_v3 = vpop.permute.xlu0 %1967  ;;  %4379 = vmatpush3.msk.msra.mxu0 %vm5104_vm4, %v1970_v62 }
 0x7f8   : > { %4380 = vmatprep.subr.msk.mxu0 %vm5104_vm4, %v1968_v3 }
 0x7f9   : > { %4381 = vmatpush3.msk.msra.mxu0 %vm5104_vm4, %v1968_v3  ;;  %v1966_v4 = vpop.permute.xlu1 %1965 }
 0x7fa   : > { %4382 = vmatprep.subr.msk.mxu0 %vm5104_vm4, %v1966_v4 }
 0x7fb   : > { %v2013_v38 = vpop.permute.xlu0 %2012  ;;  %4383 = vmatpush3.msk.msra.mxu0 %vm5104_vm4, %v1966_v4 }
 0x7fc   : > { %4385 = vmatmul.mubr.msk.f32.vlgmr.msra.gmra.mxu0 %vm1158_vm3, %v2040_v5  ;;  %4424 = vmatprep.subr.msk.mxu0 %vm4004_vm7, %v2013_v38 }
 0x7fd   : > { %4425 = vmatpush3.msk.msra.mxu0 %vm4004_vm7, %v2013_v38  ;;  %v2011_v40 = vpop.permute.xlu1 %2010  ;;  %4387 = vmatprep.mubr.msk.f32.mxu0 %vm1158_vm3, %v2041_v39 }
 0x7fe   : > { %4426 = vmatprep.subr.msk.mxu0 %vm4004_vm7, %v2011_v40 }
 0x7ff   : > { %v2009_v20 = vpop.permute.xlu0 %2008  ;;  %4427 = vmatpush3.msk.msra.mxu0 %vm4004_vm7, %v2011_v40 }
 0x800   : > { %4388 = vmatmul.mubr.msk.f32.gmra.mxu0 %vm1158_vm3, %v2042_v9  ;;  %4428 = vmatprep.subr.msk.mxu0 %vm4004_vm7, %v2009_v20 }
 0x801   : > { %4429 = vmatpush3.msk.msra.mxu0 %vm4004_vm7, %v2009_v20  ;;  %v2007_v21 = vpop.permute.xlu1 %2006  ;;  %4390 = vmatprep.mubr.msk.f32.mxu0 %vm1158_vm3, %v2043_v19 }
 0x802   : > { %4430 = vmatprep.subr.msk.mxu0 %vm4004_vm7, %v2007_v21 }
 0x803   : > { %v2005_v24 = vpop.permute.xlu0 %2004  ;;  %4431 = vmatpush3.msk.msra.mxu0 %vm4004_vm7, %v2007_v21 }
 0x804   : > { %4391 = vmatmul.mubr.msk.f32.gmra.mxu0 %vm1158_vm3, %v2044_v22  ;;  %4432 = vmatprep.subr.msk.mxu0 %vm4004_vm7, %v2005_v24 }
 0x805   : > { %4433 = vmatpush3.msk.msra.mxu0 %vm4004_vm7, %v2005_v24  ;;  %v2003_v25 = vpop.permute.xlu1 %2002  ;;  %4393 = vmatprep.mubr.msk.f32.mxu0 %vm1158_vm3, %v2045_v23  ;;  %v2296_v23 = vpop.f32.mrf.mxu1 }
 0x806   : > { %4434 = vmatprep.subr.msk.mxu0 %vm4004_vm7, %v2003_v25 }
 0x807   : > { %v2001_v27 = vpop.permute.xlu0 %2000  ;;  %4435 = vmatpush3.msk.msra.mxu0 %vm4004_vm7, %v2003_v25 }
 0x808   : > { %4394 = vmatmul.mubr.msk.f32.gmra.mxu0 %vm1158_vm3, %v2046_v6  ;;  %4436 = vmatprep.subr.msk.mxu0 %vm4004_vm7, %v2001_v27 }
 0x809   : > { %4437 = vmatpush3.msk.msra.mxu0 %vm4004_vm7, %v2001_v27  ;;  %v1999_v17 = vpop.permute.xlu1 %1998  ;;  %4440 = vmatprep.mubr.msk.f32.mxu0 %vm1158_vm3, %v3880_v26 }
 0x80a   : > { %4438 = vmatprep.subr.msk.mxu0 %vm4004_vm7, %v1999_v17 }
 0x80b   : > { %4439 = vmatpush3.msk.msra.mxu0 %vm4004_vm7, %v1999_v17 }
 0x80c   : > { %4441 = vmatmul.mubr.msk.f32.vlgmr.msra.gmra.mxu0 %vm1158_vm3, %v3881_v28 }
 0x80d   : > { %4443 = vmatprep.mubr.msk.f32.mxu0 %vm1158_vm3, %v3882_v29 }
 0x810   : > { %4444 = vmatmul.mubr.msk.f32.gmra.mxu0 %vm1158_vm3, %v3883_v12 }
 0x811   : > { %4446 = vmatprep.mubr.msk.f32.mxu0 %vm1158_vm3, %v3884_v30 }
 0x814   : > { %4447 = vmatmul.mubr.msk.f32.gmra.mxu0 %vm1158_vm3, %v3885_v16  ;;  %v2462_v33 = vpop.permute.xlu0 %2461 }
 0x815   : > { %4449 = vmatprep.mubr.msk.f32.mxu0 %vm1158_vm3, %v3886_v31 }
 0x816   : > { %v2467_v32 = vpop.permute.xlu1 %2466 }
 0x818   : > { %4450 = vmatmul.mubr.msk.f32.gmra.mxu0 %vm1158_vm3, %v3887_v8  ;;  %v2518_v7 = vpop.permute.xlu0 %2517 }
 0x81a   : > { %v2523_v10 = vpop.permute.xlu1 %2522 }
 0x81c   : > { %v2472_v44 = vpop.permute.xlu0 %2471 }
 0x81e   : > { %v2477_v42 = vpop.permute.xlu1 %2476 }
 0x820   : > { %v2528_v50 = vpop.permute.xlu0 %2527 }
 0x822   : > { %v2533_v48 = vpop.permute.xlu1 %2532 }
 0x824   : > { %v2482_v18 = vpop.permute.xlu0 %2481 }
 0x826   : > { %v2487_v53 = vpop.permute.xlu1 %2486 }
 0x828   : > { %v2538_v5 = vpop.permute.xlu0 %2537 }
 0x82a   : > { %v2543_v63 = vpop.permute.xlu1 %2542 }
 0x82c   : > { %v2492_v31 = vpop.permute.xlu0 %2491 }
 0x82e   : > { %v2497_v27 = vpop.permute.xlu1 %2496 }
 0x8bc   : > { %v4386_v36 = vpop.f32.mrf.mxu0 }
 0x8bd   : > { %v2272_v11 = vadd.f32 %v4414_v34, %v4386_v36 }
 0x8be   : > { %v2137_v43 = vpop.f32.mrf.mxu0 }
 0x8bf   : > { %v2267_v58 = vadd.f32 %v2266_v37, %v2137_v43 }
 0x8c0   : > { %v4389_v45 = vpop.f32.mrf.mxu0 }
 0x8c1   : > { %v2282_v61 = vadd.f32 %v4417_v13, %v4389_v45  ;;  %v2553_v45 = vpop.permute.xlu1 %2552 }
 0x8c2   : > { %v2147_v46 = vpop.f32.mrf.mxu0 }
 0x8c3   : > { %v2277_v2 = vadd.f32 %v2276_v49, %v2147_v46 }
 0x8c4   : > { %v4392_v14 = vpop.f32.mrf.mxu0 }
 0x8c5   : > { %v2292_v39 = vadd.f32 %v4420_v52, %v4392_v14  ;;  %v2548_v14 = vpop.permute.xlu0 %2547 }
 0x8c6   : > { %v2157_v51 = vpop.f32.mrf.mxu0 }
 0x8c7   : > { %v2287_v21 = vadd.f32 %v2286_v47, %v2157_v51 }
 0x8c8   : > { %v4395_v15 = vpop.f32.mrf.mxu0 }
 0x8c9   : > { %v2302_v17 = vadd.f32 %v4423_v60, %v4395_v15 }
 0x8ca   : > { %v2167_v54 = vpop.f32.mrf.mxu0 }
 0x8cb   : > { %v2297_v8 = vadd.f32 %v2296_v23, %v2167_v54 }
 0x8cc   : > { %v4442_v57 = vpop.f32.mrf.mxu0 }
 0x8cd   : > { %v2444_v41 = vadd.f32 %v4442_v57, %v2272_v11  ;;  %v2661_v57 = vld [vmem:[%s6232_s12 + $0x10] sm:$0xff] }
 0x8ce   : > { %v2404_v59 = vpop.f32.mrf.mxu0 }
 0x8cf   : > { %v2500_v56 = vmul.f32 %v2467_v32, %v2444_v41  ;;  %v2443_v55 = vadd.f32 %v2404_v59, %v2267_v58  ;;  %v2660_v41 = vld [vmem:[%s6232_s12 + $0x8] sm:$0xff] }
 0x8d0   : > { %v4445_v0 = vpop.f32.mrf.mxu0 }
 0x8d1   : > { %v2556_v62 = vadd.f32 %v2523_v10, %v2500_v56  ;;  %v2499_v3 = vmul.f32 %v2462_v33, %v2443_v55  ;;  %v2446_v4 = vadd.f32 %v4445_v0, %v2282_v61 }
 0x8d2   : > { %v2414_v38 = vpop.f32.mrf.mxu0 }
 0x8d3   : > { %v5696_v40 = vmax.f32 %v2556_v62, 0.0  ;;  %v2555_v9 = vadd.f32 %v2518_v7, %v2499_v3  ;;  %v2502_v19 = vmul.f32 %v2477_v42, %v2446_v4  ;;  %v2445_v20 = vadd.f32 %v2414_v38, %v2277_v2  ;;  %v2659_v3 = vld [vmem:[%s6232_s12] sm:$0xff] }
 0x8d4   : > { %v4448_v22 = vpop.f32.mrf.mxu0 }
 0x8d5   : > { %v5698_v24 = vmax.f32 %v2555_v9, 0.0  ;;  %v2558_v25 = vadd.f32 %v2533_v48, %v2502_v19  ;;  %v2501_v6 = vmul.f32 %v2472_v44, %v2445_v20  ;;  %v2448_v26 = vadd.f32 %v4448_v22, %v2292_v39  ;;  %2574 = vrot.lane.b32.xlu1 %v5696_v40, %s4624_s1 }
 0x8d6   : > { %v2424_v28 = vpop.f32.mrf.mxu0 }
 0x8d7   : > { %v5702_v29 = vmax.f32 %v2558_v25, 0.0  ;;  %v2557_v12 = vadd.f32 %v2528_v50, %v2501_v6  ;;  %v2504_v30 = vmul.f32 %v2487_v53, %v2448_v26  ;;  %v2447_v16 = vadd.f32 %v2424_v28, %v2287_v21  ;;  %2571 = vrot.lane.b32.xlu0 %v5698_v24, %s4624_s1 }
 0x8d8   : > { %v4451_v32 = vpop.f32.mrf.mxu0 }
 0x8d9   : > { %v5706_v33 = vmax.f32 %v2557_v12, 0.0  ;;  %v2560_v10 = vadd.f32 %v2543_v63, %v2504_v30  ;;  %v2503_v34 = vmul.f32 %v2482_v18, %v2447_v16  ;;  %v2450_v7 = vadd.f32 %v4451_v32, %v2302_v17  ;;  %2580 = vrot.lane.b32.xlu1 %v5702_v29, %s4624_s1  ;;  %v2662_v18 = vld [vmem:[%s6232_s12 + $0x18] sm:$0xff] }
 0x8da   : > { %v2434_v36 = vpop.f32.mrf.mxu0  ;;  %4452 = vmatprep.subr.mxu1 %v2662_v18 }
 0x8db   : > { %v5710_v37 = vmax.f32 %v2560_v10, 0.0  ;;  %v2559_v42 = vadd.f32 %v2538_v5, %v2503_v34  ;;  %v2506_v43 = vmul.f32 %v2497_v27, %v2450_v7  ;;  %v2449_v44 = vadd.f32 %v2434_v36, %v2297_v8  ;;  %2577 = vrot.lane.b32.xlu0 %v5706_v33, %s4624_s1  ;;  %4453 = vmatpush3.msra.mxu1 %v2662_v18 }
 0x8dc   : > { %4454 = vmatprep.subr.mxu1 %v2661_v57 }
 0x8dd   : > { %v5714_v13 = vmax.f32 %v2559_v42, 0.0  ;;  %v2562_v46 = vadd.f32 %v2553_v45, %v2506_v43  ;;  %v2505_v48 = vmul.f32 %v2492_v31, %v2449_v44  ;;  %2586 = vrot.lane.b32.xlu1 %v5710_v37, %s4624_s1  ;;  %4455 = vmatpush3.msra.mxu1 %v2661_v57 }
 0x8de   : > { %4456 = vmatprep.subr.mxu1 %v2660_v41 }
 0x8df   : > { %v5718_v49 = vmax.f32 %v2562_v46, 0.0  ;;  %v2561_v50 = vadd.f32 %v2548_v14, %v2505_v48  ;;  %2583 = vrot.lane.b32.xlu0 %v5714_v13, %s4624_s1  ;;  %4457 = vmatpush3.msra.mxu1 %v2660_v41 }
 0x8e0   : > { %4458 = vmatprep.subr.mxu1 %v2659_v3 }
 0x8e1   : > { %v5722_v51 = vmax.f32 %v2561_v50, 0.0  ;;  %2592 = vrot.lane.b32.xlu1 %v5718_v49, %s4624_s1  ;;  %4459 = vmatpush3.msra.mxu1 %v2659_v3  ;;  %v3920_v3 = vld [vmem:[%s6233_s13 + $0x40] sm:$0xff] }
 0x8e3   : > { %2589 = vrot.lane.b32.xlu0 %v5722_v51, %s4624_s1 }
 0x947   : > { %v2575_v15 = vpop.permute.xlu1 %2574 }
 0x948   : > { %v2576_v52 = vsel %vm1908_vm6, %v2575_v15, %v5696_v40 }
 0x949   : > { %2597 = vrot.lane.b32.xlu1 %v2576_v52, %s4624_s1  ;;  %v2572_v53 = vpop.permute.xlu0 %2571 }
 0x94a   : > { %v2573_v54 = vsel %vm1908_vm6, %v2572_v53, %v5698_v24 }
 0x94b   : > { %v2581_v11 = vpop.permute.xlu1 %2580  ;;  %2595 = vrot.lane.b32.xlu0 %v2573_v54, %s4624_s1 }
 0x94c   : > { %v2582_v58 = vsel %vm1908_vm6, %v2581_v11, %v5702_v29 }
 0x94d   : > { %2601 = vrot.lane.b32.xlu1 %v2582_v58, %s4624_s1  ;;  %v2578_v47 = vpop.permute.xlu0 %2577 }
 0x94e   : > { %v2579_v59 = vsel %vm1908_vm6, %v2578_v47, %v5706_v33 }
 0x94f   : > { %v2587_v61 = vpop.permute.xlu1 %2586  ;;  %2599 = vrot.lane.b32.xlu0 %v2579_v59, %s4624_s1 }
 0x950   : > { %v2588_v56 = vsel %vm1908_vm6, %v2587_v61, %v5710_v37 }
 0x951   : > { %2605 = vrot.lane.b32.xlu1 %v2588_v56, %s4624_s1  ;;  %v2584_v55 = vpop.permute.xlu0 %2583 }
 0x952   : > { %v2585_v63 = vsel %vm1908_vm6, %v2584_v55, %v5714_v13 }
 0x953   : > { %v2593_v0 = vpop.permute.xlu1 %2592  ;;  %2603 = vrot.lane.b32.xlu0 %v2585_v63, %s4624_s1 }
 0x954   : > { %v2594_v2 = vsel %vm1908_vm6, %v2593_v0, %v5718_v49 }
 0x955   : > { %2609 = vrot.lane.b32.xlu1 %v2594_v2, %s4624_s1  ;;  %v2590_v60 = vpop.permute.xlu0 %2589 }
 0x956   : > { %v2591_v62 = vsel %vm1908_vm6, %v2590_v60, %v5722_v51 }
 0x957   : > { %2607 = vrot.lane.b32.xlu0 %v2591_v62, %s4624_s1  ;;  %s4626_s1 = smov 16   ;;  %v2924_v62 = vld [vmem:[%s6233_s13] sm:$0xff] }
 0x958   : > { %4488 = vmatprep.mubr.msk.f32.mxu0 %vm1158_vm3, %v2924_v62  ;;  %v3963_v62 = vld [vmem:[%s6233_s13 + $0x98] sm:$0xff] }
 0x9bb   : > { %v2598_v4 = vpop.permute.xlu1 %2597 }
 0x9bc   : > { %v2612_v5 = vsel %vm1908_vm6, %v2598_v4, %v5696_v40 }
 0x9bd   : > { %2629 = vrot.lane.b32.xlu1 %v2612_v5, %s4621_s18  ;;  %v2596_v39 = vpop.permute.xlu0 %2595 }
 0x9be   : > { %v2611_v38 = vsel %vm1908_vm6, %v2596_v39, %v5698_v24  ;;  %v3921_v39 = vld [vmem:[%s6233_s13 + $0x48] sm:$0xff] }
 0x9bf   : > { %v2602_v9 = vpop.permute.xlu1 %2601  ;;  %2627 = vrot.lane.b32.xlu0 %v2611_v38, %s4621_s18 }
 0x9c0   : > { %v2614_v19 = vsel %vm1908_vm6, %v2602_v9, %v5702_v29 }
 0x9c1   : > { %2633 = vrot.lane.b32.xlu1 %v2614_v19, %s4621_s18  ;;  %v2600_v20 = vpop.permute.xlu0 %2599 }
 0x9c2   : > { %v2613_v21 = vsel %vm1908_vm6, %v2600_v20, %v5706_v33  ;;  %v3922_v20 = vld [vmem:[%s6233_s13 + $0x50] sm:$0xff] }
 0x9c3   : > { %v2606_v22 = vpop.permute.xlu1 %2605  ;;  %2631 = vrot.lane.b32.xlu0 %v2613_v21, %s4621_s18 }
 0x9c4   : > { %v2616_v23 = vsel %vm1908_vm6, %v2606_v22, %v5710_v37  ;;  %v3923_v22 = vld [vmem:[%s6233_s13 + $0x58] sm:$0xff] }
 0x9c5   : > { %2637 = vrot.lane.b32.xlu1 %v2616_v23, %s4621_s18  ;;  %v2604_v25 = vpop.permute.xlu0 %2603 }
 0x9c6   : > { %v2615_v6 = vsel %vm1908_vm6, %v2604_v25, %v5714_v13 }
 0x9c7   : > { %v2610_v26 = vpop.permute.xlu1 %2609  ;;  %2635 = vrot.lane.b32.xlu0 %v2615_v6, %s4621_s18 }
 0x9c8   : > { %v2618_v27 = vsel %vm1908_vm6, %v2610_v26, %v5718_v49  ;;  %v3924_v26 = vld [vmem:[%s6233_s13 + $0x60] sm:$0xff] }
 0x9c9   : > { %2641 = vrot.lane.b32.xlu1 %v2618_v27, %s4621_s18  ;;  %v2608_v17 = vpop.permute.xlu0 %2607 }
 0x9ca   : > { %v2617_v28 = vsel %vm1908_vm6, %v2608_v17, %v5722_v51  ;;  %v3925_v17 = vld [vmem:[%s6233_s13 + $0x68] sm:$0xff] }
 0x9cb   : > { %2639 = vrot.lane.b32.xlu0 %v2617_v28, %s4621_s18 }
 0xa2f   : > { %v2630_v12 = vpop.permute.xlu1 %2629 }
 0xa30   : > { %v2652_v31 = vmax.f32 %v5696_v40, %v2630_v12 }
 0xa31   : > { %v2628_v30 = vpop.permute.xlu0 %2627 }
 0xa32   : > { %v2651_v16 = vmax.f32 %v5698_v24, %v2628_v30  ;;  %v3926_v30 = vld [vmem:[%s6233_s13 + $0x70] sm:$0xff] }
 0xa33   : > { %v2634_v8 = vpop.permute.xlu1 %2633 }
 0xa34   : > { %4460 = vmatprep.mubr.msk.f32.mxu1 %vm2663_vm8, %v2651_v16  ;;  %v2654_v34 = vmax.f32 %v5702_v29, %v2634_v8  ;;  %v3927_v16 = vld [vmem:[%s6233_s13 + $0x78] sm:$0xff]  ;;  %v3337_v8 = vld [vmem:[%s6234_s14 + $0x8] sm:$0xff] }
 0xa35   : > { %4461 = vmatmul.mubr.msk.f32.vlgmr.msra.gmra.mxu1 %vm2663_vm8, %v2652_v31  ;;  %v2632_v32 = vpop.permute.xlu0 %2631  ;;  %v3336_v31 = vld [vmem:[%s6234_s14] sm:$0xff] }
 0xa36   : > { %v2653_v10 = vmax.f32 %v5706_v33, %v2632_v32  ;;  %v3392_v32 = vld [vmem:[%s6235_s15] sm:$0xff] }
 0xa37   : > { %v2638_v7 = vpop.permute.xlu1 %2637 }
 0xa38   : > { %4463 = vmatprep.mubr.msk.f32.mxu1 %vm2663_vm8, %v2653_v10  ;;  %v2656_v40 = vmax.f32 %v5710_v37, %v2638_v7  ;;  %v3393_v10 = vld [vmem:[%s6235_s15 + $0x8] sm:$0xff]  ;;  %v3339_v7 = vld [vmem:[%s6234_s14 + $0x18] sm:$0xff] }
 0xa39   : > { %4464 = vmatmul.mubr.msk.f32.gmra.mxu1 %vm2663_vm8, %v2654_v34  ;;  %v2636_v36 = vpop.permute.xlu0 %2635  ;;  %v3338_v34 = vld [vmem:[%s6234_s14 + $0x10] sm:$0xff] }
 0xa3a   : > { %v2655_v24 = vmax.f32 %v5714_v13, %v2636_v36  ;;  %v3394_v36 = vld [vmem:[%s6235_s15 + $0x10] sm:$0xff] }
 0xa3b   : > { %v2642_v42 = vpop.permute.xlu1 %2641 }
 0xa3c   : > { %4466 = vmatprep.mubr.msk.f32.mxu1 %vm2663_vm8, %v2655_v24  ;;  %v2658_v29 = vmax.f32 %v5718_v49, %v2642_v42  ;;  %v3395_v24 = vld [vmem:[%s6235_s15 + $0x18] sm:$0xff]  ;;  %v3341_v42 = vld [vmem:[%s6234_s14 + $0x28] sm:$0xff] }
 0xa3d   : > { %4467 = vmatmul.mubr.msk.f32.gmra.mxu1 %vm2663_vm8, %v2656_v40  ;;  %v2640_v43 = vpop.permute.xlu0 %2639  ;;  %v3340_v40 = vld [vmem:[%s6234_s14 + $0x20] sm:$0xff] }
 0xa3e   : > { %v2657_v33 = vmax.f32 %v5722_v51, %v2640_v43  ;;  %v3396_v43 = vld [vmem:[%s6235_s15 + $0x20] sm:$0xff] }
 0xa40   : > { %4469 = vmatprep.mubr.msk.f32.mxu1 %vm2663_vm8, %v2657_v33  ;;  %v3397_v33 = vld [vmem:[%s6235_s15 + $0x28] sm:$0xff] }
 0xa41   : > { %4470 = vmatmul.mubr.msk.f32.gmra.mxu1 %vm2663_vm8, %v2658_v29  ;;  %v3342_v29 = vld [vmem:[%s6234_s14 + $0x30] sm:$0xff] }
 0xa42   : > { %4516 = vmatprep.mubr.msk.f32.mxu1 %vm1158_vm3, %v3920_v3  ;;  %v3964_v3 = vld [vmem:[%s6233_s13 + $0xa0] sm:$0xff] }
 0xaf5   : > { %v5804_v44 = vpop.f32.mrf.mxu1 }
 0xaf7   : > { %v5806_v45 = vpop.f32.mrf.mxu1 }
 0xaf9   : > { %v5808_v13 = vpop.f32.mrf.mxu1 }
 0xafb   : > { %v5810_v37 = vpop.f32.mrf.mxu1 }
 0xafd   : > { %v5812_v46 = vpop.f32.mrf.mxu1 }
 0xaff   : > { %v5814_v48 = vpop.f32.mrf.mxu1 }
 0xb01   : > { %v4471_v14 = vpop.f32.mrf.mxu1 }
 0xb02   : > { %2815 = vrot.lane.b32.xlu0 %v4471_v14, %s4626_s1  ;;  %4500 = vmatprep.subr.mxu1 %v4471_v14 }
 0xb03   : > { %v2784_v49 = vpop.f32.mrf.mxu1  ;;  %4501 = vmatpush3.msra.mxu1 %v4471_v14 }
 0xb04   : > { %2812 = vrot.lane.b32.xlu1 %v2784_v49, %s4626_s1  ;;  %4502 = vmatprep.subr.mxu1 %v2784_v49 }
 0xb05   : > { %4503 = vmatpush3.msra.mxu1 %v2784_v49 }
 0xb06   : > { %2809 = vrot.lane.b32.xlu0 %v5812_v46, %s4626_s1  ;;  %4504 = vmatprep.subr.mxu1 %v5812_v46 }
 0xb07   : > { %4505 = vmatpush3.msra.mxu1 %v5812_v46 }
 0xb08   : > { %2806 = vrot.lane.b32.xlu1 %v5814_v48, %s4626_s1  ;;  %4506 = vmatprep.subr.mxu1 %v5814_v48 }
 0xb09   : > { %4507 = vmatpush3.msra.mxu1 %v5814_v48 }
 0xb0a   : > { %2803 = vrot.lane.b32.xlu0 %v5808_v13, %s4626_s1  ;;  %4508 = vmatprep.subr.mxu1 %v5808_v13 }
 0xb0b   : > { %4509 = vmatpush3.msra.mxu1 %v5808_v13 }
 0xb0c   : > { %2800 = vrot.lane.b32.xlu1 %v5810_v37, %s4626_s1  ;;  %4510 = vmatprep.subr.mxu1 %v5810_v37 }
 0xb0d   : > { %4511 = vmatpush3.msra.mxu1 %v5810_v37 }
 0xb0e   : > { %2797 = vrot.lane.b32.xlu0 %v5804_v44, %s4626_s1  ;;  %4512 = vmatprep.subr.mxu1 %v5804_v44 }
 0xb0f   : > { %4513 = vmatpush3.msra.mxu1 %v5804_v44 }
 0xb10   : > { %2794 = vrot.lane.b32.xlu1 %v5806_v45, %s4626_s1  ;;  %4514 = vmatprep.subr.mxu1 %v5806_v45 }
 0xb11   : > { %4515 = vmatpush3.msra.mxu1 %v5806_v45 }
 0xb12   : > { %4517 = vmatmul.mubr.msk.f32.vlgmr.msra.gmra.mxu1 %vm1158_vm3, %v3921_v39 }
 0xb13   : > { %4519 = vmatprep.mubr.msk.f32.mxu1 %vm1158_vm3, %v3922_v20 }
 0xb16   : > { %4520 = vmatmul.mubr.msk.f32.gmra.mxu1 %vm1158_vm3, %v3923_v22 }
 0xb17   : > { %4522 = vmatprep.mubr.msk.f32.mxu1 %vm1158_vm3, %v3924_v26 }
 0xb1a   : > { %4523 = vmatmul.mubr.msk.f32.gmra.mxu1 %vm1158_vm3, %v3925_v17 }
 0xb1b   : > { %4525 = vmatprep.mubr.msk.f32.mxu1 %vm1158_vm3, %v3926_v30 }
 0xb1e   : > { %4526 = vmatmul.mubr.msk.f32.gmra.mxu1 %vm1158_vm3, %v3927_v16 }
 0xb74   : > { %v2816_v50 = vpop.permute.xlu0 %2815 }
 0xb75   : > { %v2817_v51 = vsel %vm2793_vm9, %v2816_v50, %v4471_v14 }
 0xb76   : > { %2832 = vrot.lane.b32.xlu0 %v2817_v51, %s4626_s1  ;;  %v2813_v15 = vpop.permute.xlu1 %2812 }
 0xb77   : > { %v2814_v52 = vsel %vm2793_vm9, %v2813_v15, %v2784_v49 }
 0xb78   : > { %v2810_v53 = vpop.permute.xlu0 %2809  ;;  %2830 = vrot.lane.b32.xlu1 %v2814_v52, %s4626_s1  ;;  %v2925_v52 = vld [vmem:[%s6233_s13 + $0x8] sm:$0xff] }
 0xb79   : > { %v2811_v54 = vsel %vm2793_vm9, %v2810_v53, %v5812_v46  ;;  %v2926_v53 = vld [vmem:[%s6233_s13 + $0x10] sm:$0xff] }
 0xb7a   : > { %2828 = vrot.lane.b32.xlu0 %v2811_v54, %s4626_s1  ;;  %v2807_v11 = vpop.permute.xlu1 %2806 }
 0xb7b   : > { %v2808_v18 = vsel %vm2793_vm9, %v2807_v11, %v5814_v48 }
 0xb7c   : > { %v2804_v57 = vpop.permute.xlu0 %2803  ;;  %2826 = vrot.lane.b32.xlu1 %v2808_v18, %s4626_s1  ;;  %v2927_v18 = vld [vmem:[%s6233_s13 + $0x18] sm:$0xff] }
 0xb7d   : > { %v2805_v58 = vsel %vm2793_vm9, %v2804_v57, %v5808_v13 }
 0xb7e   : > { %2824 = vrot.lane.b32.xlu0 %v2805_v58, %s4626_s1  ;;  %v2801_v47 = vpop.permute.xlu1 %2800 }
 0xb7f   : > { %v2802_v41 = vsel %vm2793_vm9, %v2801_v47, %v5810_v37  ;;  %v2929_v47 = vld [vmem:[%s6233_s13 + $0x28] sm:$0xff] }
 0xb80   : > { %v2798_v59 = vpop.permute.xlu0 %2797  ;;  %2822 = vrot.lane.b32.xlu1 %v2802_v41, %s4626_s1  ;;  %v2930_v41 = vld [vmem:[%s6233_s13 + $0x30] sm:$0xff] }
 0xb81   : > { %v2799_v61 = vsel %vm2793_vm9, %v2798_v59, %v5804_v44 }
 0xb82   : > { %2820 = vrot.lane.b32.xlu0 %v2799_v61, %s4626_s1  ;;  %v2795_v56 = vpop.permute.xlu1 %2794 }
 0xb83   : > { %v2796_v55 = vsel %vm2793_vm9, %v2795_v56, %v5806_v45  ;;  %v2931_v56 = vld [vmem:[%s6233_s13 + $0x38] sm:$0xff] }
 0xb84   : > { %2818 = vrot.lane.b32.xlu1 %v2796_v55, %s4626_s1  ;;  %v3960_v55 = vld [vmem:[%s6233_s13 + $0x80] sm:$0xff] }
 0xbe8   : > { %v2833_v63 = vpop.permute.xlu0 %2832 }
 0xbe9   : > { %v2841_v0 = vsel %vm2793_vm9, %v2833_v63, %v4471_v14 }
 0xbea   : > { %2864 = vrot.lane.b32.xlu0 %v2841_v0, %s4627_s0  ;;  %v2831_v2 = vpop.permute.xlu1 %2830 }
 0xbeb   : > { %v2840_v60 = vsel %vm2793_vm9, %v2831_v2, %v2784_v49  ;;  %v3961_v2 = vld [vmem:[%s6233_s13 + $0x88] sm:$0xff] }
 0xbec   : > { %v2829_v4 = vpop.permute.xlu0 %2828  ;;  %2862 = vrot.lane.b32.xlu1 %v2840_v60, %s4627_s0 }
 0xbed   : > { %v2839_v5 = vsel %vm2793_vm9, %v2829_v4, %v5812_v46  ;;  %v3966_v4 = vld [vmem:[%s6233_s13 + $0xb0] sm:$0xff] }
 0xbee   : > { %2860 = vrot.lane.b32.xlu0 %v2839_v5, %s4627_s0  ;;  %v2827_v38 = vpop.permute.xlu1 %2826 }
 0xbef   : > { %v2838_v9 = vsel %vm2793_vm9, %v2827_v38, %v5814_v48 }
 0xbf0   : > { %v2825_v19 = vpop.permute.xlu0 %2824  ;;  %2858 = vrot.lane.b32.xlu1 %v2838_v9, %s4627_s0 }
 0xbf1   : > { %v2837_v21 = vsel %vm2793_vm9, %v2825_v19, %v5808_v13  ;;  %v3399_v13 = vld [vmem:[%s6235_s15 + $0x38] sm:$0xff]  ;;  %v4518_v19 = vpop.f32.mrf.mxu1 }
 0xbf2   : > { %2856 = vrot.lane.b32.xlu0 %v2837_v21, %s4627_s0  ;;  %v2823_v23 = vpop.permute.xlu1 %2822 }
 0xbf3   : > { %v2836_v25 = vsel %vm2793_vm9, %v2823_v23, %v5810_v37  ;;  %v3151_v22 = vpop.f32.mrf.mxu1 }
 0xbf4   : > { %v2821_v6 = vpop.permute.xlu0 %2820  ;;  %2854 = vrot.lane.b32.xlu1 %v2836_v25, %s4627_s0 }
 0xbf5   : > { %v2835_v27 = vsel %vm2793_vm9, %v2821_v6, %v5804_v44  ;;  %v3343_v44 = vld [vmem:[%s6234_s14 + $0x38] sm:$0xff] }
 0xbf6   : > { %2852 = vrot.lane.b32.xlu0 %v2835_v27, %s4627_s0  ;;  %v2819_v28 = vpop.permute.xlu1 %2818 }
 0xbf7   : > { %v2834_v12 = vsel %vm2793_vm9, %v2819_v28, %v5806_v45  ;;  %v3398_v45 = vld [vmem:[%s6235_s15 + $0x30] sm:$0xff] }
 0xbf8   : > { %2850 = vrot.lane.b32.xlu1 %v2834_v12, %s4627_s0 }
 0xbfa   : > { %2897 = vrot.lane.b32.xlu0 %v2841_v0, %s4621_s18 }
 0xbfc   : > { %2895 = vrot.lane.b32.xlu1 %v2840_v60, %s4621_s18  ;;  %v3962_v60 = vld [vmem:[%s6233_s13 + $0x90] sm:$0xff] }
 0xbfe   : > { %2893 = vrot.lane.b32.xlu0 %v2839_v5, %s4621_s18  ;;  %v3967_v5 = vld [vmem:[%s6233_s13 + $0xb8] sm:$0xff] }
 0xc00   : > { %2891 = vrot.lane.b32.xlu1 %v2838_v9, %s4621_s18 }
 0xc02   : > { %2889 = vrot.lane.b32.xlu0 %v2837_v21, %s4621_s18 }
 0xc04   : > { %2887 = vrot.lane.b32.xlu1 %v2836_v25, %s4621_s18 }
 0xc06   : > { %2885 = vrot.lane.b32.xlu0 %v2835_v27, %s4621_s18  ;;  %v4521_v27 = vpop.f32.mrf.mxu1 }
 0xc08   : > { %2883 = vrot.lane.b32.xlu1 %v2834_v12, %s4621_s18  ;;  %v3161_v30 = vpop.f32.mrf.mxu1 }
 0xc0a   : > { %3346 = vperm.xlu0 %4589, %v3336_v31  }
 0xc0c   : > { %3351 = vperm.xlu1 %4590, %v3337_v8  }
 0xc0e   : > { %3402 = vperm.xlu0 %4589, %v3392_v32   ;;  %v4524_v32 = vpop.f32.mrf.mxu1 }
 0xc10   : > { %3407 = vperm.xlu1 %4590, %v3393_v10  }
 0xc12   : > { %3356 = vperm.xlu0 %4589, %v3338_v34  }
 0xc14   : > { %3361 = vperm.xlu1 %4590, %v3339_v7  }
 0xc16   : > { %3412 = vperm.xlu0 %4589, %v3394_v36  }
 0xc18   : > { %3417 = vperm.xlu1 %4590, %v3395_v24  }
 0xc1a   : > { %3366 = vperm.xlu0 %4589, %v3340_v40  }
 0xc1c   : > { %3371 = vperm.xlu1 %4590, %v3341_v42   ;;  %v3171_v42 = vpop.f32.mrf.mxu1 }
 0xc1e   : > { %3422 = vperm.xlu0 %4589, %v3396_v43  }
 0xc20   : > { %3427 = vperm.xlu1 %4590, %v3397_v33  }
 0xc22   : > { %3376 = vperm.xlu0 %4589, %v3342_v29  }
 0xc24   : > { %3381 = vperm.xlu1 %4590, %v3343_v44  }
 0xc26   : > { %3432 = vperm.xlu0 %4589, %v3398_v45  }
 0xc28   : > { %3437 = vperm.xlu1 %4590, %v3399_v13  }
 0xc5c   : > { %v2865_v37 = vpop.permute.xlu0 %2864 }
 0xc5d   : > { %4472 = vmatprep.subr.msk.mxu0 %vm5104_vm4, %v2865_v37 }
 0xc5e   : > { %4473 = vmatpush3.msk.msra.mxu0 %vm5104_vm4, %v2865_v37  ;;  %v2863_v46 = vpop.permute.xlu1 %2862 }
 0xc5f   : > { %4474 = vmatprep.subr.msk.mxu0 %vm5104_vm4, %v2863_v46 }
 0xc60   : > { %v2861_v48 = vpop.permute.xlu0 %2860  ;;  %4475 = vmatpush3.msk.msra.mxu0 %vm5104_vm4, %v2863_v46 }
 0xc61   : > { %4476 = vmatprep.subr.msk.mxu0 %vm5104_vm4, %v2861_v48 }
 0xc62   : > { %4477 = vmatpush3.msk.msra.mxu0 %vm5104_vm4, %v2861_v48  ;;  %v2859_v14 = vpop.permute.xlu1 %2858  ;;  %v4527_v48 = vpop.f32.mrf.mxu1 }
 0xc63   : > { %4478 = vmatprep.subr.msk.mxu0 %vm5104_vm4, %v2859_v14 }
 0xc64   : > { %v2857_v49 = vpop.permute.xlu0 %2856  ;;  %4479 = vmatpush3.msk.msra.mxu0 %vm5104_vm4, %v2859_v14 }
 0xc65   : > { %4480 = vmatprep.subr.msk.mxu0 %vm5104_vm4, %v2857_v49 }
 0xc66   : > { %4481 = vmatpush3.msk.msra.mxu0 %vm5104_vm4, %v2857_v49  ;;  %v2855_v50 = vpop.permute.xlu1 %2854 }
 0xc67   : > { %4482 = vmatprep.subr.msk.mxu0 %vm5104_vm4, %v2855_v50 }
 0xc68   : > { %v2853_v51 = vpop.permute.xlu0 %2852  ;;  %4483 = vmatpush3.msk.msra.mxu0 %vm5104_vm4, %v2855_v50 }
 0xc69   : > { %4484 = vmatprep.subr.msk.mxu0 %vm5104_vm4, %v2853_v51 }
 0xc6a   : > { %4485 = vmatpush3.msk.msra.mxu0 %vm5104_vm4, %v2853_v51  ;;  %v2851_v15 = vpop.permute.xlu1 %2850 }
 0xc6b   : > { %4486 = vmatprep.subr.msk.mxu0 %vm5104_vm4, %v2851_v15 }
 0xc6c   : > { %v2898_v54 = vpop.permute.xlu0 %2897  ;;  %4487 = vmatpush3.msk.msra.mxu0 %vm5104_vm4, %v2851_v15 }
 0xc6d   : > { %4489 = vmatmul.mubr.msk.f32.vlgmr.msra.gmra.mxu0 %vm1158_vm3, %v2925_v52  ;;  %4528 = vmatprep.subr.msk.mxu0 %vm4005_vm10, %v2898_v54 }
 0xc6e   : > { %4529 = vmatpush3.msk.msra.mxu0 %vm4005_vm10, %v2898_v54  ;;  %v2896_v11 = vpop.permute.xlu1 %2895  ;;  %4491 = vmatprep.mubr.msk.f32.mxu0 %vm1158_vm3, %v2926_v53 }
 0xc6f   : > { %4530 = vmatprep.subr.msk.mxu0 %vm4005_vm10, %v2896_v11 }
 0xc70   : > { %v2894_v57 = vpop.permute.xlu0 %2893  ;;  %4531 = vmatpush3.msk.msra.mxu0 %vm4005_vm10, %v2896_v11 }
 0xc71   : > { %4492 = vmatmul.mubr.msk.f32.gmra.mxu0 %vm1158_vm3, %v2927_v18  ;;  %4532 = vmatprep.subr.msk.mxu0 %vm4005_vm10, %v2894_v57 }
 0xc72   : > { %4533 = vmatpush3.msk.msra.mxu0 %vm4005_vm10, %v2894_v57  ;;  %v2892_v58 = vpop.permute.xlu1 %2891  ;;  %4494 = vmatprep.mubr.msk.f32.mxu0 %vm1158_vm3, %v2928_v35 }
 0xc73   : > { %4534 = vmatprep.subr.msk.mxu0 %vm4005_vm10, %v2892_v58 }
 0xc74   : > { %v2890_v59 = vpop.permute.xlu0 %2889  ;;  %4535 = vmatpush3.msk.msra.mxu0 %vm4005_vm10, %v2892_v58  ;;  %v3181_v58 = vpop.f32.mrf.mxu1 }
 0xc75   : > { %4495 = vmatmul.mubr.msk.f32.gmra.mxu0 %vm1158_vm3, %v2929_v47  ;;  %4536 = vmatprep.subr.msk.mxu0 %vm4005_vm10, %v2890_v59 }
 0xc76   : > { %4537 = vmatpush3.msk.msra.mxu0 %vm4005_vm10, %v2890_v59  ;;  %v2888_v61 = vpop.permute.xlu1 %2887  ;;  %4497 = vmatprep.mubr.msk.f32.mxu0 %vm1158_vm3, %v2930_v41 }
 0xc77   : > { %4538 = vmatprep.subr.msk.mxu0 %vm4005_vm10, %v2888_v61 }
 0xc78   : > { %v2886_v63 = vpop.permute.xlu0 %2885  ;;  %4539 = vmatpush3.msk.msra.mxu0 %vm4005_vm10, %v2888_v61 }
 0xc79   : > { %4498 = vmatmul.mubr.msk.f32.gmra.mxu0 %vm1158_vm3, %v2931_v56  ;;  %4540 = vmatprep.subr.msk.mxu0 %vm4005_vm10, %v2886_v63 }
 0xc7a   : > { %4541 = vmatpush3.msk.msra.mxu0 %vm4005_vm10, %v2886_v63  ;;  %v2884_v0 = vpop.permute.xlu1 %2883  ;;  %4544 = vmatprep.mubr.msk.f32.mxu0 %vm1158_vm3, %v3960_v55 }
 0xc7b   : > { %4542 = vmatprep.subr.msk.mxu0 %vm4005_vm10, %v2884_v0 }
 0xc7c   : > { %4543 = vmatpush3.msk.msra.mxu0 %vm4005_vm10, %v2884_v0 }
 0xc7d   : > { %4545 = vmatmul.mubr.msk.f32.vlgmr.msra.gmra.mxu0 %vm1158_vm3, %v3961_v2 }
 0xc7e   : > { %4547 = vmatprep.mubr.msk.f32.mxu0 %vm1158_vm3, %v3962_v60 }
 0xc81   : > { %4548 = vmatmul.mubr.msk.f32.gmra.mxu0 %vm1158_vm3, %v3963_v62 }
 0xc82   : > { %4550 = vmatprep.mubr.msk.f32.mxu0 %vm1158_vm3, %v3964_v3 }
 0xc85   : > { %4551 = vmatmul.mubr.msk.f32.gmra.mxu0 %vm1158_vm3, %v3965_v1  ;;  %v3347_v38 = vpop.permute.xlu0 %3346 }
 0xc86   : > { %4553 = vmatprep.mubr.msk.f32.mxu0 %vm1158_vm3, %v3966_v4 }
 0xc87   : > { %v3352_v39 = vpop.permute.xlu1 %3351 }
 0xc89   : > { %4554 = vmatmul.mubr.msk.f32.gmra.mxu0 %vm1158_vm3, %v3967_v5  ;;  %v3403_v20 = vpop.permute.xlu0 %3402 }
 0xc8b   : > { %v3408_v9 = vpop.permute.xlu1 %3407 }
 0xc8d   : > { %v3357_v6 = vpop.permute.xlu0 %3356 }
 0xc8f   : > { %v3362_v23 = vpop.permute.xlu1 %3361 }
 0xc91   : > { %v3413_v16 = vpop.permute.xlu0 %3412 }
 0xc93   : > { %v3418_v28 = vpop.permute.xlu1 %3417 }
 0xc95   : > { %v3367_v36 = vpop.permute.xlu0 %3366 }
 0xc97   : > { %v3372_v10 = vpop.permute.xlu1 %3371 }
 0xc99   : > { %v3423_v51 = vpop.permute.xlu0 %3422 }
 0xc9b   : > { %v3428_v13 = vpop.permute.xlu1 %3427 }
 0xc9d   : > { %v3377_v3 = vpop.permute.xlu0 %3376 }
 0xc9f   : > { %v3382_v56 = vpop.permute.xlu1 %3381 }
 0xd2d   : > { %v4490_v21 = vpop.f32.mrf.mxu0 }
 0xd2e   : > { %v3157_v7 = vadd.f32 %v4518_v19, %v4490_v21 }
 0xd2f   : > { %v3022_v25 = vpop.f32.mrf.mxu0 }
 0xd30   : > { %v3152_v40 = vadd.f32 %v3151_v22, %v3022_v25  ;;  %v3438_v25 = vpop.permute.xlu1 %3437 }
 0xd31   : > { %v4493_v26 = vpop.f32.mrf.mxu0 }
 0xd32   : > { %v3167_v29 = vadd.f32 %v4521_v27, %v4493_v26 }
 0xd33   : > { %v3032_v17 = vpop.f32.mrf.mxu0 }
 0xd34   : > { %v3162_v46 = vadd.f32 %v3161_v30, %v3032_v17  ;;  %v3433_v17 = vpop.permute.xlu0 %3432 }
 0xd35   : > { %v4496_v12 = vpop.f32.mrf.mxu0 }
 0xd36   : > { %v3177_v15 = vadd.f32 %v4524_v32, %v4496_v12 }
 0xd37   : > { %v3042_v31 = vpop.f32.mrf.mxu0 }
 0xd38   : > { %v3172_v35 = vadd.f32 %v3171_v42, %v3042_v31 }
 0xd39   : > { %v4499_v8 = vpop.f32.mrf.mxu0 }
 0xd3a   : > { %v3187_v55 = vadd.f32 %v4527_v48, %v4499_v8 }
 0xd3b   : > { %v3052_v34 = vpop.f32.mrf.mxu0 }
 0xd3c   : > { %v3182_v1 = vadd.f32 %v3181_v58, %v3052_v34  ;;  %v3545_v34 = vld [vmem:[%s6236_s16 + $0x8] sm:$0xff] }
 0xd3d   : > { %v4546_v24 = vpop.f32.mrf.mxu0  ;;  %4556 = vmatprep.subr.mxu1 %v3545_v34 }
 0xd3e   : > { %v3329_v43 = vadd.f32 %v4546_v24, %v3157_v7  ;;  %v3544_v7 = vld [vmem:[%s6236_s16] sm:$0xff]  ;;  %4557 = vmatpush3.msra.mxu1 %v3545_v34 }
 0xd3f   : > { %v3289_v33 = vpop.f32.mrf.mxu0  ;;  %4558 = vmatprep.subr.mxu1 %v3544_v7 }
 0xd40   : > { %v3385_v44 = vmul.f32 %v3352_v39, %v3329_v43  ;;  %v3328_v45 = vadd.f32 %v3289_v33, %v3152_v40  ;;  %4559 = vmatpush3.msra.mxu1 %v3544_v7 }
 0xd41   : > { %v4549_v37 = vpop.f32.mrf.mxu0 }
 0xd42   : > { %v3441_v14 = vadd.f32 %v3408_v9, %v3385_v44  ;;  %v3384_v49 = vmul.f32 %v3347_v38, %v3328_v45  ;;  %v3331_v50 = vadd.f32 %v4549_v37, %v3167_v29 }
 0xd43   : > { %v3299_v52 = vpop.f32.mrf.mxu0 }
 0xd44   : > { %v6103_v53 = vmax.f32 %v3441_v14, 0.0  ;;  %v3440_v54 = vadd.f32 %v3403_v20, %v3384_v49  ;;  %v3387_v11 = vmul.f32 %v3362_v23, %v3331_v50  ;;  %v3330_v18 = vadd.f32 %v3299_v52, %v3162_v46 }
 0xd45   : > { %v4552_v57 = vpop.f32.mrf.mxu0 }
 0xd46   : > { %v6105_v47 = vmax.f32 %v3440_v54, 0.0  ;;  %v3443_v41 = vadd.f32 %v3418_v28, %v3387_v11  ;;  %v3386_v59 = vmul.f32 %v3357_v6, %v3330_v18  ;;  %v3333_v61 = vadd.f32 %v4552_v57, %v3177_v15  ;;  %3459 = vrot.lane.b32.xlu1 %v6103_v53, %s4626_s1 }
 0xd47   : > { %v3309_v63 = vpop.f32.mrf.mxu0 }
 0xd48   : > { %v6109_v0 = vmax.f32 %v3443_v41, 0.0  ;;  %v3442_v2 = vadd.f32 %v3413_v16, %v3386_v59  ;;  %v3389_v60 = vmul.f32 %v3372_v10, %v3333_v61  ;;  %v3332_v62 = vadd.f32 %v3309_v63, %v3172_v35  ;;  %3456 = vrot.lane.b32.xlu0 %v6105_v47, %s4626_s1 }
 0xd49   : > { %v4555_v4 = vpop.f32.mrf.mxu0 }
 0xd4a   : > { %v6113_v5 = vmax.f32 %v3442_v2, 0.0  ;;  %v3445_v39 = vadd.f32 %v3428_v13, %v3389_v60  ;;  %v3388_v38 = vmul.f32 %v3367_v36, %v3332_v62  ;;  %v3335_v9 = vadd.f32 %v4555_v4, %v3187_v55  ;;  %3465 = vrot.lane.b32.xlu1 %v6109_v0, %s4626_s1 }
 0xd4b   : > { %v3319_v19 = vpop.f32.mrf.mxu0 }
 0xd4c   : > { %v6117_v20 = vmax.f32 %v3445_v39, 0.0  ;;  %v3444_v21 = vadd.f32 %v3423_v51, %v3388_v38  ;;  %v3391_v22 = vmul.f32 %v3382_v56, %v3335_v9  ;;  %v3334_v23 = vadd.f32 %v3319_v19, %v3182_v1  ;;  %3462 = vrot.lane.b32.xlu0 %v6113_v5, %s4626_s1 }
 0xd4e   : > { %v6121_v6 = vmax.f32 %v3444_v21, 0.0  ;;  %v3447_v26 = vadd.f32 %v3438_v25, %v3391_v22  ;;  %v3390_v27 = vmul.f32 %v3377_v3, %v3334_v23  ;;  %3471 = vrot.lane.b32.xlu1 %v6117_v20, %s4626_s1 }
 0xd50   : > { %v6125_v28 = vmax.f32 %v3447_v26, 0.0  ;;  %v3446_v12 = vadd.f32 %v3433_v17, %v3390_v27  ;;  %3468 = vrot.lane.b32.xlu0 %v6121_v6, %s4626_s1 }
 0xd52   : > { %v6129_v30 = vmax.f32 %v3446_v12, 0.0  ;;  %3477 = vrot.lane.b32.xlu1 %v6125_v28, %s4626_s1 }
 0xd54   : > { %3474 = vrot.lane.b32.xlu0 %v6129_v30, %s4626_s1 }
 0xdb8   : > { %v3460_v16 = vpop.permute.xlu1 %3459 }
 0xdb9   : > { %v3461_v31 = vsel %vm2793_vm9, %v3460_v16, %v6103_v53 }
 0xdba   : > { %3482 = vrot.lane.b32.xlu1 %v3461_v31, %s4626_s1  ;;  %v3457_v8 = vpop.permute.xlu0 %3456 }
 0xdbb   : > { %v3458_v32 = vsel %vm2793_vm9, %v3457_v8, %v6105_v47 }
 0xdbc   : > { %v3466_v10 = vpop.permute.xlu1 %3465  ;;  %3480 = vrot.lane.b32.xlu0 %v3458_v32, %s4626_s1 }
 0xdbd   : > { %v3467_v36 = vsel %vm2793_vm9, %v3466_v10, %v6109_v0 }
 0xdbe   : > { %3486 = vrot.lane.b32.xlu1 %v3467_v36, %s4626_s1  ;;  %v3463_v24 = vpop.permute.xlu0 %3462 }
 0xdbf   : > { %v3464_v40 = vsel %vm2793_vm9, %v3463_v24, %v6113_v5 }
 0xdc0   : > { %v3472_v42 = vpop.permute.xlu1 %3471  ;;  %3484 = vrot.lane.b32.xlu0 %v3464_v40, %s4626_s1 }
 0xdc1   : > { %v3473_v43 = vsel %vm2793_vm9, %v3472_v42, %v6117_v20 }
 0xdc2   : > { %3490 = vrot.lane.b32.xlu1 %v3473_v43, %s4626_s1  ;;  %v3469_v33 = vpop.permute.xlu0 %3468 }
 0xdc3   : > { %v3470_v29 = vsel %vm2793_vm9, %v3469_v33, %v6121_v6 }
 0xdc4   : > { %v3478_v44 = vpop.permute.xlu1 %3477  ;;  %3488 = vrot.lane.b32.xlu0 %v3470_v29, %s4626_s1 }
 0xdc5   : > { %v3479_v45 = vsel %vm2793_vm9, %v3478_v44, %v6125_v28 }
 0xdc6   : > { %3494 = vrot.lane.b32.xlu1 %v3479_v45, %s4626_s1  ;;  %v3475_v13 = vpop.permute.xlu0 %3474 }
 0xdc7   : > { %v3476_v37 = vsel %vm2793_vm9, %v3475_v13, %v6129_v30 }
 0xdc8   : > { %3492 = vrot.lane.b32.xlu0 %v3476_v37, %s4626_s1 }
 0xe2c   : > { %v3483_v46 = vpop.permute.xlu1 %3482 }
 0xe2d   : > { %v3497_v48 = vsel %vm2793_vm9, %v3483_v46, %v6103_v53 }
 0xe2e   : > { %3514 = vrot.lane.b32.xlu1 %v3497_v48, %s4621_s18  ;;  %v3481_v14 = vpop.permute.xlu0 %3480 }
 0xe2f   : > { %v3496_v49 = vsel %vm2793_vm9, %v3481_v14, %v6105_v47 }
 0xe30   : > { %v3487_v50 = vpop.permute.xlu1 %3486  ;;  %3512 = vrot.lane.b32.xlu0 %v3496_v49, %s4621_s18 }
 0xe31   : > { %v3499_v51 = vsel %vm2793_vm9, %v3487_v50, %v6109_v0 }
 0xe32   : > { %3518 = vrot.lane.b32.xlu1 %v3499_v51, %s4621_s18  ;;  %v3485_v15 = vpop.permute.xlu0 %3484 }
 0xe33   : > { %v3498_v52 = vsel %vm2793_vm9, %v3485_v15, %v6113_v5 }
 0xe34   : > { %v3491_v54 = vpop.permute.xlu1 %3490  ;;  %3516 = vrot.lane.b32.xlu0 %v3498_v52, %s4621_s18 }
 0xe35   : > { %v3501_v11 = vsel %vm2793_vm9, %v3491_v54, %v6117_v20 }
 0xe36   : > { %3522 = vrot.lane.b32.xlu1 %v3501_v11, %s4621_s18  ;;  %v3489_v18 = vpop.permute.xlu0 %3488 }
 0xe37   : > { %v3500_v35 = vsel %vm2793_vm9, %v3489_v18, %v6121_v6 }
 0xe38   : > { %v3495_v57 = vpop.permute.xlu1 %3494  ;;  %3520 = vrot.lane.b32.xlu0 %v3500_v35, %s4621_s18 }
 0xe39   : > { %v3503_v58 = vsel %vm2793_vm9, %v3495_v57, %v6125_v28 }
 0xe3a   : > { %3526 = vrot.lane.b32.xlu1 %v3503_v58, %s4621_s18  ;;  %v3493_v41 = vpop.permute.xlu0 %3492 }
 0xe3b   : > { %v3502_v59 = vsel %vm2793_vm9, %v3493_v41, %v6129_v30 }
 0xe3c   : > { %3524 = vrot.lane.b32.xlu0 %v3502_v59, %s4621_s18  ;;  %s4002_s18 = sshll.u32 %s6246_s25, 6 }
 0xe3d   : > { %s542_s26 = scalar_lea.vmem %s6237_s17, %s4002_s18 }
 0xea0   : > { %v3515_v61 = vpop.permute.xlu1 %3514 }
 0xea1   : > { %v3537_v63 = vmax.f32 %v6103_v53, %v3515_v61 }
 0xea2   : > { %v3513_v56 = vpop.permute.xlu0 %3512 }
 0xea3   : > { %v3536_v55 = vmax.f32 %v6105_v47, %v3513_v56 }
 0xea4   : > { %v3519_v2 = vpop.permute.xlu1 %3518 }
 0xea5   : > { %4560 = vmatprep.mubr.msk.f32.mxu1 %vm3546_vm11, %v3536_v55  ;;  %v3539_v3 = vmax.f32 %v6109_v0, %v3519_v2 }
 0xea6   : > { %4561 = vmatmul.mubr.msk.f32.vlgmr.msra.gmra.mxu1 %vm3546_vm11, %v3537_v63  ;;  %v3517_v60 = vpop.permute.xlu0 %3516 }
 0xea7   : > { %v3538_v62 = vmax.f32 %v6113_v5, %v3517_v60 }
 0xea8   : > { %v3523_v1 = vpop.permute.xlu1 %3522 }
 0xea9   : > { %4563 = vmatprep.mubr.msk.f32.mxu1 %vm3546_vm11, %v3538_v62  ;;  %v3541_v53 = vmax.f32 %v6117_v20, %v3523_v1 }
 0xeaa   : > { %4564 = vmatmul.mubr.msk.f32.gmra.mxu1 %vm3546_vm11, %v3539_v3  ;;  %v3521_v4 = vpop.permute.xlu0 %3520 }
 0xeab   : > { %v3540_v47 = vmax.f32 %v6121_v6, %v3521_v4 }
 0xeac   : > { %v3527_v39 = vpop.permute.xlu1 %3526 }
 0xead   : > { %4566 = vmatprep.mubr.msk.f32.mxu1 %vm3546_vm11, %v3540_v47  ;;  %v3543_v0 = vmax.f32 %v6125_v28, %v3527_v39 }
 0xeae   : > { %4567 = vmatmul.mubr.msk.f32.gmra.mxu1 %vm3546_vm11, %v3541_v53  ;;  %v3525_v38 = vpop.permute.xlu0 %3524 }
 0xeaf   : > { %v3542_v5 = vmax.f32 %v6129_v30, %v3525_v38 }
 0xeb1   : > { %4569 = vmatprep.mubr.msk.f32.mxu1 %vm3546_vm11, %v3542_v5 }
 0xeb2   : > { %4570 = vmatmul.mubr.msk.f32.gmra.mxu1 %vm3546_vm11, %v3543_v0 }
 0xf66   : > { %v4562_v9 = vpop.f32.mrf.mxu1 }
 0xf67   : > { %3678 = vst.msk [vmem:[%s542_s26 + $0x8] sm:$0xff] %vm3676_vm12, %v4562_v9 }
 0xf68   : > { %v3637_v19 = vpop.f32.mrf.mxu1 }
 0xf69   : > { %3677 = vst.msk [vmem:[%s542_s26] sm:$0xff] %vm3676_vm12, %v3637_v19 }
 0xf6a   : > { %v4565_v20 = vpop.f32.mrf.mxu1 }
 0xf6b   : > { %3680 = vst.msk [vmem:[%s542_s26 + $0x18] sm:$0xff] %vm3676_vm12, %v4565_v20 }
 0xf6c   : > { %v3647_v21 = vpop.f32.mrf.mxu1 }
 0xf6d   : > { %3679 = vst.msk [vmem:[%s542_s26 + $0x10] sm:$0xff] %vm3676_vm12, %v3647_v21 }
 0xf6e   : > { %v4568_v22 = vpop.f32.mrf.mxu1 }
 0xf6f   : > { %3682 = vst.msk [vmem:[%s542_s26 + $0x28] sm:$0xff] %vm3676_vm12, %v4568_v22 }
 0xf70   : > { %v3657_v23 = vpop.f32.mrf.mxu1 }
 0xf71   : > { %3681 = vst.msk [vmem:[%s542_s26 + $0x20] sm:$0xff] %vm3676_vm12, %v3657_v23 }
 0xf72   : > { %v4571_v25 = vpop.f32.mrf.mxu1 }
 0xf73   : > { %3684 = vst.msk [vmem:[%s542_s26 + $0x38] sm:$0xff] %vm3676_vm12, %v4571_v25 }
 0xf74   : > { %v3667_v6 = vpop.f32.mrf.mxu1 }
 0xf75   : > { %3683 = vst.msk [vmem:[%s542_s26 + $0x30] sm:$0xff] %vm3676_vm12, %v3667_v6 }
 0xf76 PF: > { %s27_s24 = sadd.s32 1, %s4617_s24  }
 0xf77   : > { %p24_p4 = scmp.ge.s32.totalorder %s27_s24, 4  }
 0xf79   :  { %26 = sbr.rel (!%p24_p4) target bundleno = 3 (0x3), region = 126 }

</bundles_post_ra>
